<compile_context>
chip_gen: v6e
topology: v6e:2x2x1
jax: 0.10.0
libtpu: 0.0.40
codegen_flags: <defaults>
</compile_context>

<pallas_src>
import functools

import jax
import jax.numpy as jnp
from jax.experimental import pallas as pl
from jax.experimental.pallas import tpu as pltpu

LEAKY_SLOPE = 0.2
BN_EPS = 0.8                     # nn.BatchNorm2d(out_filters, 0.8) -> eps = 0.8
MATMUL_DTYPE = jnp.bfloat16      # MXU operand dtype; accumulation + epilogue stay f32


def _pick_batch_tile(n, target):
    """Largest divisor of n <= target, preferring >= 2 grid steps (v7x megacore)."""
    divisors = [d for d in range(1, n + 1) if n % d == 0]
    preferred = [d for d in divisors if d <= target and n // d >= 2]
    if preferred:
        return max(preferred)
    fitting = [d for d in divisors if d <= target]
    return max(fitting) if fitting else n


def _banded_conv_weights(w_oihw, b_eff, shift, wi, ci, wo, co, dtype):
    """Fold the 1x3 horizontal conv (stride 2, pad 1) into block-banded matrices.

    Activation lanes are laid out as w*Ci + ci (no stored horizontal padding; the pad
    columns are simply absent from the band).  Returns:
      wb02 : (Wi*Ci, 2*Wo*Co)  [kh=0 | kh=2] taps concatenated along N,
      wb1  : (Wi*Ci, Wo*Co)    kh=1 tap,
      bs   : (2, Wo*Co) f32    row 0 = folded conv bias, row 1 = eval-BN shift (tiled per ow).
    """
    wt = jnp.transpose(w_oihw, (2, 3, 1, 0)).astype(jnp.float32)      # (kh, kw, ci, co)
    wb = jnp.zeros((3, wi * ci, wo * co), jnp.float32)
    for kh in range(3):
        for kw in range(3):
            for ow in range(wo):
                w_in = 2 * ow + kw - 1
                if 0 <= w_in < wi:
                    wb = wb.at[kh,
                               w_in * ci:(w_in + 1) * ci,
                               ow * co:(ow + 1) * co].set(wt[kh, kw])
    wb02 = jnp.concatenate([wb[0], wb[2]], axis=1).astype(dtype)
    wb1 = wb[1].astype(dtype)
    bs = jnp.stack([jnp.tile(b_eff, wo), jnp.tile(shift, wo)], axis=0).astype(jnp.float32)
    return wb02, wb1, bs


# ---------------------------------------------------------------------------
# Fused kernel: 4 conv blocks + linear head for one batch tile of `bt` images
# ---------------------------------------------------------------------------
def _dcdisc_fused_kernel(x_ref,
                         wb02_1, wb1_1, bs_1,
                         wb02_2, wb1_2, bs_2,
                         wb02_3, wb1_3, bs_3,
                         wb02_4, wb1_4, bs_4,
                         wlin_ref,
                         o_ref,
                         s2, s3, s4,
                         *, dims, bt, negative_slope, compute_dtype):
    # Zero the padded-activation scratch so every image's top/bottom pad rows are zero.
    s2[...] = jnp.zeros_like(s2)
    s3[...] = jnp.zeros_like(s3)
    s4[...] = jnp.zeros_like(s4)

    def conv_layer(a_ref, wb02_ref, wb1_ref, bs_ref, hi, ho, n_out, has_bn):
        """Conv(3,2,1)+bias+LeakyReLU(+BN shift) over all `bt` images resident in a_ref.

        a_ref : (bt*(hi+2), Wi*Ci) f32, per-image rows = [zero pad, data rows, zero pad].
        Returns a list of bt per-image (ho, n_out) f32 outputs (lanes = ow*Co + co).
        """
        hp = hi + 2                                   # padded rows per image (even)
        g = ho + 1                                    # phase-0 row groups per image
        half = bt * hp // 2
        a_even = a_ref[pl.ds(0, half, 2), :].astype(compute_dtype)   # padded rows 0,2,...
        a_odd = a_ref[pl.ds(1, half, 2), :].astype(compute_dtype)    # padded rows 1,3,...
        p02 = jnp.dot(a_even, wb02_ref[...], preferred_element_type=jnp.float32)
        p1 = jnp.dot(a_odd, wb1_ref[...], preferred_element_type=jnp.float32)
        bias = bs_ref[0:1, :]
        shift = bs_ref[1:2, :]
        ys = []
        for b in range(bt):
            r0 = b * g
            y = (p02[r0:r0 + ho, 0:n_out]                     # kh = 0 tap
                 + p02[r0 + 1:r0 + 1 + ho, n_out:2 * n_out]   # kh = 2 tap (next row group)
                 + p1[r0:r0 + ho, :])                         # kh = 1 tap
            y = y + bias                                      # conv bias (BN scale folded)
            y = jnp.maximum(y, negative_slope * y)            # LeakyReLU(0.2)
            if has_bn:
                y = y + shift                                 # eval BN: beta - scale*mean
            ys.append(y)
        return ys

    acts = (x_ref, s2, s3, s4)
    weights = ((wb02_1, wb1_1, bs_1), (wb02_2, wb1_2, bs_2),
               (wb02_3, wb1_3, bs_3), (wb02_4, wb1_4, bs_4))

    for li in range(4):
        hi, _, _, ho, wo, co = dims[li]
        wb02_ref, wb1_ref, bs_ref = weights[li]
        ys = conv_layer(acts[li], wb02_ref, wb1_ref, bs_ref, hi, ho, wo * co,
                        has_bn=(li > 0))
        if li < 3:
            nxt = acts[li + 1]
            hp_next = ho + 2
            for b in range(bt):
                nxt[b * hp_next + 1:b * hp_next + 1 + ho, :] = ys[b]
        else:
            # Fused Linear(128*ds*ds, 1) head; weight pre-permuted to this feature layout.
            wlin = wlin_ref[...]                              # (ds, ds*128) f32
            rows = []
            for b in range(bt):
                v = jnp.sum(ys[b] * wlin)                     # bias added on the host
                rows.append(jnp.full((1, 128), v, jnp.float32))
            o_ref[...] = jnp.concatenate(rows, axis=0)        # lane-dense (bt, 128) store


# ---------------------------------------------------------------------------
# Forward pass
# ---------------------------------------------------------------------------
def dc_discriminator_forward(img_nchw, params, *, compute_dtype=MATMUL_DTYPE, batch_tile=8):
    n, c_in, h, w = img_nchw.shape
    assert h % 16 == 0 and w % 16 == 0, "4 stride-2 blocks need H, W divisible by 16"
    bt = _pick_batch_tile(n, batch_tile)
    chans = [c_in, 16, 32, 64, 128]

    hp1 = h + 2
    dims, weight_args, in_specs = [], [], []
    in_specs.append(pl.BlockSpec((None, bt * hp1, w * c_in), lambda i: (i, 0, 0)))

    hi, wi = h, w
    for li, blk in enumerate(params["blocks"]):
        ci, co = chans[li], chans[li + 1]
        ho, wo = hi // 2, wi // 2
        if blk["bn"] is not None:
            # Eval BN: fold the (positive) scale through LeakyReLU into W and b; add the
            # shift in the epilogue.  Valid because scale = gamma/sqrt(var+eps) > 0 for the
            # default gamma=1.
            # TODO(synk): with trained checkpoints gamma may be negative -> keep the scale in
            # the epilogue instead of folding it.
            gamma, beta, rmean, rvar = blk["bn"]
            scale = gamma * jax.lax.rsqrt(rvar + BN_EPS)
            shift = beta - rmean * scale
            w_eff = blk["w"] * scale[:, None, None, None]
            b_eff = blk["b"] * scale
        else:
            shift = jnp.zeros((co,), jnp.float32)
            w_eff, b_eff = blk["w"], blk["b"]
        wb02, wb1, bs = _banded_conv_weights(w_eff, b_eff, shift, wi, ci, wo, co,
                                             compute_dtype)
        weight_args += [wb02, wb1, bs]
        k_l, n_l = wi * ci, wo * co
        in_specs += [pl.BlockSpec((k_l, 2 * n_l), lambda i: (0, 0)),
                     pl.BlockSpec((k_l, n_l), lambda i: (0, 0)),
                     pl.BlockSpec((2, n_l), lambda i: (0, 0))]
        dims.append((hi, wi, ci, ho, wo, co))
        hi, wi = ho, wo

    # Linear head weight permuted from NCHW-flatten order to the kernel's (oh, ow*Co + co)
    # feature layout (one-time host transpose of a tiny matrix).
    ds_h, ds_w, co4 = hi, wi, chans[-1]
    w_lin, b_lin = params["linear"]
    wlin_perm = jnp.transpose(w_lin[:, 0].reshape(co4, ds_h, ds_w),
                              (1, 2, 0)).reshape(ds_h, ds_w * co4).astype(jnp.float32)
    in_specs.append(pl.BlockSpec((ds_h, ds_w * co4), lambda i: (0, 0)))

    # Input: NCHW -> per-image (H+2, W*C) rows with zero top/bottom pad rows, kept in f32 so
    # the in-kernel strided (row parity) loads stay on unpacked 32-bit sublanes.  Dropout2d
    # is identity in the deterministic (eval) forward.
    x = jnp.transpose(img_nchw, (0, 2, 3, 1)).reshape(n, h, w * c_in).astype(jnp.float32)
    x = jnp.pad(x, ((0, 0), (1, 1), (0, 0)))
    x3d = x.reshape(n // bt, bt * hp1, w * c_in)

    # Padded-activation VMEM scratch for the inputs of blocks 2..4 (never touches HBM).
    scratch = [pltpu.VMEM((bt * (dims[li][3] + 2), dims[li][4] * dims[li][5]), jnp.float32)
               for li in range(3)]

    kernel = functools.partial(
        _dcdisc_fused_kernel, dims=tuple(dims), bt=bt,
        negative_slope=LEAKY_SLOPE, compute_dtype=compute_dtype)

    head = pl.pallas_call(
        kernel,
        out_shape=jax.ShapeDtypeStruct((n // bt, bt, 128), jnp.float32),
        grid=(n // bt,),
        in_specs=in_specs,
        out_specs=pl.BlockSpec((None, bt, 128), lambda i: (i, 0, 0)),
        scratch_shapes=scratch,
        compiler_params=pltpu.CompilerParams(
            dimension_semantics=("parallel",),           # batch-tile steps pipeline / shard
            vmem_limit_bytes=32 * 1024 * 1024),
    )(x3d, *weight_args, wlin_perm)

    validity = head.reshape(n, 128)[:, :1] + b_lin[None, :]
    return validity


# ---------------------------------------------------------------------------
# Parameters (deterministic, PyTorch-shaped)
# ---------------------------------------------------------------------------
def init_params(key, img_shape):
    c_in = img_shape[0]
    ds = img_shape[1] // 2 ** 4
    chans = [c_in, 16, 32, 64, 128]
    params = {"blocks": []}
    keys = jax.random.split(key, 10)
    ki = 0
    for li in range(4):
        cin, cout = chans[li], chans[li + 1]
        w = 0.05 * jax.random.normal(keys[ki], (cout, cin, 3, 3), jnp.float32); ki += 1
        b = 0.01 * jax.random.normal(keys[ki], (cout,), jnp.float32); ki += 1
        if li == 0:
            bn = None                              # first block: bn=False
        else:
            # PyTorch BatchNorm2d defaults: gamma=1, beta=0, running mean=0, running var=1
            bn = (jnp.ones((cout,), jnp.float32), jnp.zeros((cout,), jnp.float32),
                  jnp.zeros((cout,), jnp.float32), jnp.ones((cout,), jnp.float32))
        params["blocks"].append({"w": w, "b": b, "bn": bn})
    lin_in = 128 * ds * ds
    w_lin = 0.05 * jax.random.normal(keys[ki], (lin_in, 1), jnp.float32); ki += 1
    b_lin = 0.01 * jax.random.normal(keys[ki], (1,), jnp.float32)
    params["linear"] = (w_lin, b_lin)
    return params


# ---------------------------------------------------------------------------
# Pure-JAX reference (validates the fused-kernel decomposition in-script)
# ---------------------------------------------------------------------------
def _reference_forward(img_nchw, params):
    x = img_nchw.astype(jnp.float32)
    for blk in params["blocks"]:
        x = jax.lax.conv_general_dilated(
            x, blk["w"], window_strides=(2, 2), padding=((1, 1), (1, 1)),
            dimension_numbers=("NCHW", "OIHW", "NCHW"))
        x = x + blk["b"][None, :, None, None]
        x = jnp.where(x >= 0.0, x, LEAKY_SLOPE * x)
        if blk["bn"] is not None:
            gamma, beta, rmean, rvar = blk["bn"]
            inv = gamma * jax.lax.rsqrt(rvar + BN_EPS)
            x = (x - rmean[None, :, None, None]) * inv[None, :, None, None] \
                + beta[None, :, None, None]
    feat = x.reshape(x.shape[0], -1)                       # PyTorch NCHW flatten order
    w_lin, b_lin = params["linear"]
    return feat @ w_lin + b_lin[None, :]


if __name__ == "__main__":
    key = jax.random.PRNGKey(0)
    img_shape = (4, 16, 16)                 # (C, H, W); ds = 16 // 2**4 = 1
    batch = 2
    k_img, k_par = jax.random.split(key)
    img = jax.random.normal(k_img, (batch,) + img_shape, jnp.float32)   # NCHW, like PyTorch
    params = init_params(k_par, img_shape)

    # 1) validate the fused-kernel decomposition in f32 against a pure-JAX reference.
    ref = jax.block_until_ready(_reference_forward(img, params))
    val_f32 = jax.block_until_ready(
        jax.jit(functools.partial(dc_discriminator_forward,
                                  compute_dtype=jnp.float32))(img, params))
    err = float(jnp.max(jnp.abs(val_f32 - ref)))
    assert err < 2e-3, f"kernel/reference mismatch: max abs err = {err}"

    # 2) production path: bf16 MXU operands, f32 accumulation/epilogue.
    validity = jax.block_until_ready(jax.jit(dc_discriminator_forward)(img, params))
    assert validity.shape == (batch, 1), validity.shape
    assert bool(jnp.all(jnp.isfinite(validity)))
    print("KERNEL_OK")
</pallas_src>

<mosaic_0001>
module attributes {stable_mosaic.version = 11 : i64} {
  func.func @_dcdisc_fused_kernel(%arg0: i32, %arg1: memref<1x18x64xf32, #tpu.memory_space<vmem>>, %arg2: memref<64x256xf32, #tpu.memory_space<vmem>>, %arg3: memref<64x128xf32, #tpu.memory_space<vmem>>, %arg4: memref<2x128xf32, #tpu.memory_space<vmem>>, %arg5: memref<128x256xf32, #tpu.memory_space<vmem>>, %arg6: memref<128x128xf32, #tpu.memory_space<vmem>>, %arg7: memref<2x128xf32, #tpu.memory_space<vmem>>, %arg8: memref<128x256xf32, #tpu.memory_space<vmem>>, %arg9: memref<128x128xf32, #tpu.memory_space<vmem>>, %arg10: memref<2x128xf32, #tpu.memory_space<vmem>>, %arg11: memref<128x256xf32, #tpu.memory_space<vmem>>, %arg12: memref<128x128xf32, #tpu.memory_space<vmem>>, %arg13: memref<2x128xf32, #tpu.memory_space<vmem>>, %arg14: memref<1x128xf32, #tpu.memory_space<vmem>>, %arg15: memref<1x1x128xf32, #tpu.memory_space<vmem>>, %arg16: memref<10x128xf32, #tpu.memory_space<vmem>>, %arg17: memref<6x128xf32, #tpu.memory_space<vmem>>, %arg18: memref<4x128xf32, #tpu.memory_space<vmem>>) attributes {dimension_semantics = [#tpu.dimension_semantics<parallel>], iteration_bounds = array<i64: 2>, scalar_prefetch = 0 : i64, scratch_operands = 3 : i64, tpu.core_type = #tpu.core_type<tc>, window_params = [{transform_indices = @transform_0, window_bounds = array<i64: 1, 18, 64>}, {pipeline_mode = #tpu.pipeline_mode<synchronous>, transform_indices = @transform_1, window_bounds = array<i64: 64, 256>}, {pipeline_mode = #tpu.pipeline_mode<synchronous>, transform_indices = @transform_2, window_bounds = array<i64: 64, 128>}, {pipeline_mode = #tpu.pipeline_mode<synchronous>, transform_indices = @transform_3, window_bounds = array<i64: 2, 128>}, {pipeline_mode = #tpu.pipeline_mode<synchronous>, transform_indices = @transform_4, window_bounds = array<i64: 128, 256>}, {pipeline_mode = #tpu.pipeline_mode<synchronous>, transform_indices = @transform_5, window_bounds = array<i64: 128, 128>}, {pipeline_mode = #tpu.pipeline_mode<synchronous>, transform_indices = @transform_6, window_bounds = array<i64: 2, 128>}, {pipeline_mode = #tpu.pipeline_mode<synchronous>, transform_indices = @transform_7, window_bounds = array<i64: 128, 256>}, {pipeline_mode = #tpu.pipeline_mode<synchronous>, transform_indices = @transform_8, window_bounds = array<i64: 128, 128>}, {pipeline_mode = #tpu.pipeline_mode<synchronous>, transform_indices = @transform_9, window_bounds = array<i64: 2, 128>}, {pipeline_mode = #tpu.pipeline_mode<synchronous>, transform_indices = @transform_10, window_bounds = array<i64: 128, 256>}, {pipeline_mode = #tpu.pipeline_mode<synchronous>, transform_indices = @transform_11, window_bounds = array<i64: 128, 128>}, {pipeline_mode = #tpu.pipeline_mode<synchronous>, transform_indices = @transform_12, window_bounds = array<i64: 2, 128>}, {pipeline_mode = #tpu.pipeline_mode<synchronous>, transform_indices = @transform_13, window_bounds = array<i64: 1, 128>}, {transform_indices = @transform_14, window_bounds = array<i64: 1, 1, 128>}]} {
    %cst = arith.constant 0.000000e+00 : f32
    %0 = vector.broadcast %cst : f32 to vector<10x128xf32>
    %c0 = arith.constant 0 : index
    %c0_0 = arith.constant 0 : index
    %1 = vector.load %arg16[%c0, %c0_0] : memref<10x128xf32, #tpu.memory_space<vmem>>, vector<10x128xf32>
    tpu.vector_store %arg16[%c0, %c0_0], %0 {strides = array<i32>} : memref<10x128xf32, #tpu.memory_space<vmem>>, vector<10x128xf32>,
    %cst_1 = arith.constant 0.000000e+00 : f32
    %2 = vector.broadcast %cst_1 : f32 to vector<6x128xf32>
    %c0_2 = arith.constant 0 : index
    %c0_3 = arith.constant 0 : index
    %3 = vector.load %arg17[%c0_2, %c0_3] : memref<6x128xf32, #tpu.memory_space<vmem>>, vector<6x128xf32>
    tpu.vector_store %arg17[%c0_2, %c0_3], %2 {strides = array<i32>} : memref<6x128xf32, #tpu.memory_space<vmem>>, vector<6x128xf32>,
    %cst_4 = arith.constant 0.000000e+00 : f32
    %4 = vector.broadcast %cst_4 : f32 to vector<4x128xf32>
    %c0_5 = arith.constant 0 : index
    %c0_6 = arith.constant 0 : index
    %5 = vector.load %arg18[%c0_5, %c0_6] : memref<4x128xf32, #tpu.memory_space<vmem>>, vector<4x128xf32>
    tpu.vector_store %arg18[%c0_5, %c0_6], %4 {strides = array<i32>} : memref<4x128xf32, #tpu.memory_space<vmem>>, vector<4x128xf32>,
    %c0_7 = arith.constant 0 : index
    %c0_8 = arith.constant 0 : index
    %c0_9 = arith.constant 0 : index
    %6 = tpu.strided_load %arg1[%c0_7, %c0_8, %c0_9] {strides = array<i32: 1, 2, 1>} : memref<1x18x64xf32, #tpu.memory_space<vmem>>, vector<1x9x64xf32>
    %7 = vector.shape_cast %6 : vector<1x9x64xf32> to vector<9x64xf32>
    %c0_10 = arith.constant 0 : index
    %c1 = arith.constant 1 : index
    %c0_11 = arith.constant 0 : index
    %8 = tpu.strided_load %arg1[%c0_10, %c1, %c0_11] {strides = array<i32: 1, 2, 1>} : memref<1x18x64xf32, #tpu.memory_space<vmem>>, vector<1x9x64xf32>
    %9 = vector.shape_cast %8 : vector<1x9x64xf32> to vector<9x64xf32>
    %c0_12 = arith.constant 0 : index
    %c0_13 = arith.constant 0 : index
    %10 = vector.load %arg2[%c0_12, %c0_13] : memref<64x256xf32, #tpu.memory_space<vmem>>, vector<64x256xf32>
    %cst_14 = arith.constant dense<0.000000e+00> : vector<9x256xf32>
    %11 = tpu.matmul %7, %10, %cst_14 {dimension_numbers = #tpu.dot_dimension_numbers<[1], [0], [0], [1], [0, 0, 1, 1], [], []>} : vector<9x64xf32>, vector<64x256xf32>, vector<9x256xf32> -> vector<9x256xf32>
    %c0_15 = arith.constant 0 : index
    %c0_16 = arith.constant 0 : index
    %12 = vector.load %arg3[%c0_15, %c0_16] : memref<64x128xf32, #tpu.memory_space<vmem>>, vector<64x128xf32>
    %cst_17 = arith.constant dense<0.000000e+00> : vector<9x128xf32>
    %13 = tpu.matmul %9, %12, %cst_17 {dimension_numbers = #tpu.dot_dimension_numbers<[1], [0], [0], [1], [0, 0, 1, 1], [], []>} : vector<9x64xf32>, vector<64x128xf32>, vector<9x128xf32> -> vector<9x128xf32>
    %c0_18 = arith.constant 0 : index
    %c0_19 = arith.constant 0 : index
    %14 = vector.load %arg4[%c0_18, %c0_19] : memref<2x128xf32, #tpu.memory_space<vmem>>, vector<1x128xf32>
    %15 = vector.extract_strided_slice %11 {offsets = [0, 0], sizes = [8, 128], strides = [1, 1]} : vector<9x256xf32> to vector<8x128xf32>
    %16 = vector.extract_strided_slice %11 {offsets = [1, 128], sizes = [8, 128], strides = [1, 1]} : vector<9x256xf32> to vector<8x128xf32>
    %17 = arith.addf %15, %16 : vector<8x128xf32>
    %18 = vector.extract_strided_slice %13 {offsets = [0, 0], sizes = [8, 128], strides = [1, 1]} : vector<9x128xf32> to vector<8x128xf32>
    %19 = arith.addf %17, %18 : vector<8x128xf32>
    %20 = vector.broadcast %14 : vector<1x128xf32> to vector<8x128xf32>
    %21 = arith.addf %19, %20 : vector<8x128xf32>
    %cst_20 = arith.constant 2.000000e-01 : f32
    %22 = vector.broadcast %cst_20 : f32 to vector<8x128xf32>
    %23 = arith.mulf %22, %21 : vector<8x128xf32>
    %24 = arith.maximumf %21, %23 : vector<8x128xf32>
    %c1_21 = arith.constant 1 : index
    %c0_22 = arith.constant 0 : index
    %25 = vector.load %arg16[%c1_21, %c0_22] : memref<10x128xf32, #tpu.memory_space<vmem>>, vector<8x128xf32>
    tpu.vector_store %arg16[%c1_21, %c0_22], %24 {strides = array<i32>} : memref<10x128xf32, #tpu.memory_space<vmem>>, vector<8x128xf32>,
    %c0_23 = arith.constant 0 : index
    %c0_24 = arith.constant 0 : index
    %26 = tpu.strided_load %arg16[%c0_23, %c0_24] {strides = array<i32: 2, 1>} : memref<10x128xf32, #tpu.memory_space<vmem>>, vector<5x128xf32>
    %c1_25 = arith.constant 1 : index
    %c0_26 = arith.constant 0 : index
    %27 = tpu.strided_load %arg16[%c1_25, %c0_26] {strides = array<i32: 2, 1>} : memref<10x128xf32, #tpu.memory_space<vmem>>, vector<5x128xf32>
    %c0_27 = arith.constant 0 : index
    %c0_28 = arith.constant 0 : index
    %28 = vector.load %arg5[%c0_27, %c0_28] : memref<128x256xf32, #tpu.memory_space<vmem>>, vector<128x256xf32>
    %cst_29 = arith.constant dense<0.000000e+00> : vector<5x256xf32>
    %29 = tpu.matmul %26, %28, %cst_29 {dimension_numbers = #tpu.dot_dimension_numbers<[1], [0], [0], [1], [0, 0, 1, 1], [], []>} : vector<5x128xf32>, vector<128x256xf32>, vector<5x256xf32> -> vector<5x256xf32>
    %c0_30 = arith.constant 0 : index
    %c0_31 = arith.constant 0 : index
    %30 = vector.load %arg6[%c0_30, %c0_31] : memref<128x128xf32, #tpu.memory_space<vmem>>, vector<128x128xf32>
    %cst_32 = arith.constant dense<0.000000e+00> : vector<5x128xf32>
    %31 = tpu.matmul %27, %30, %cst_32 {dimension_numbers = #tpu.dot_dimension_numbers<[1], [0], [0], [1], [0, 0, 1, 1], [], []>} : vector<5x128xf32>, vector<128x128xf32>, vector<5x128xf32> -> vector<5x128xf32>
    %c0_33 = arith.constant 0 : index
    %c0_34 = arith.constant 0 : index
    %32 = vector.load %arg7[%c0_33, %c0_34] : memref<2x128xf32, #tpu.memory_space<vmem>>, vector<1x128xf32>
    %c1_35 = arith.constant 1 : index
    %c0_36 = arith.constant 0 : index
    %33 = vector.load %arg7[%c1_35, %c0_36] : memref<2x128xf32, #tpu.memory_space<vmem>>, vector<1x128xf32>
    %34 = vector.extract_strided_slice %29 {offsets = [0, 0], sizes = [4, 128], strides = [1, 1]} : vector<5x256xf32> to vector<4x128xf32>
    %35 = vector.extract_strided_slice %29 {offsets = [1, 128], sizes = [4, 128], strides = [1, 1]} : vector<5x256xf32> to vector<4x128xf32>
    %36 = arith.addf %34, %35 : vector<4x128xf32>
    %37 = vector.extract_strided_slice %31 {offsets = [0, 0], sizes = [4, 128], strides = [1, 1]} : vector<5x128xf32> to vector<4x128xf32>
    %38 = arith.addf %36, %37 : vector<4x128xf32>
    %39 = vector.broadcast %32 : vector<1x128xf32> to vector<4x128xf32>
    %40 = arith.addf %38, %39 : vector<4x128xf32>
    %cst_37 = arith.constant 2.000000e-01 : f32
    %41 = vector.broadcast %cst_37 : f32 to vector<4x128xf32>
    %42 = arith.mulf %41, %40 : vector<4x128xf32>
    %43 = arith.maximumf %40, %42 : vector<4x128xf32>
    %44 = vector.broadcast %33 : vector<1x128xf32> to vector<4x128xf32>
    %45 = arith.addf %43, %44 : vector<4x128xf32>
    %c1_38 = arith.constant 1 : index
    %c0_39 = arith.constant 0 : index
    %46 = vector.load %arg17[%c1_38, %c0_39] : memref<6x128xf32, #tpu.memory_space<vmem>>, vector<4x128xf32>
    tpu.vector_store %arg17[%c1_38, %c0_39], %45 {strides = array<i32>} : memref<6x128xf32, #tpu.memory_space<vmem>>, vector<4x128xf32>,
    %c0_40 = arith.constant 0 : index
    %c0_41 = arith.constant 0 : index
    %47 = tpu.strided_load %arg17[%c0_40, %c0_41] {strides = array<i32: 2, 1>} : memref<6x128xf32, #tpu.memory_space<vmem>>, vector<3x128xf32>
    %c1_42 = arith.constant 1 : index
    %c0_43 = arith.constant 0 : index
    %48 = tpu.strided_load %arg17[%c1_42, %c0_43] {strides = array<i32: 2, 1>} : memref<6x128xf32, #tpu.memory_space<vmem>>, vector<3x128xf32>
    %c0_44 = arith.constant 0 : index
    %c0_45 = arith.constant 0 : index
    %49 = vector.load %arg8[%c0_44, %c0_45] : memref<128x256xf32, #tpu.memory_space<vmem>>, vector<128x256xf32>
    %cst_46 = arith.constant dense<0.000000e+00> : vector<3x256xf32>
    %50 = tpu.matmul %47, %49, %cst_46 {dimension_numbers = #tpu.dot_dimension_numbers<[1], [0], [0], [1], [0, 0, 1, 1], [], []>} : vector<3x128xf32>, vector<128x256xf32>, vector<3x256xf32> -> vector<3x256xf32>
    %c0_47 = arith.constant 0 : index
    %c0_48 = arith.constant 0 : index
    %51 = vector.load %arg9[%c0_47, %c0_48] : memref<128x128xf32, #tpu.memory_space<vmem>>, vector<128x128xf32>
    %cst_49 = arith.constant dense<0.000000e+00> : vector<3x128xf32>
    %52 = tpu.matmul %48, %51, %cst_49 {dimension_numbers = #tpu.dot_dimension_numbers<[1], [0], [0], [1], [0, 0, 1, 1], [], []>} : vector<3x128xf32>, vector<128x128xf32>, vector<3x128xf32> -> vector<3x128xf32>
    %c0_50 = arith.constant 0 : index
    %c0_51 = arith.constant 0 : index
    %53 = vector.load %arg10[%c0_50, %c0_51] : memref<2x128xf32, #tpu.memory_space<vmem>>, vector<1x128xf32>
    %c1_52 = arith.constant 1 : index
    %c0_53 = arith.constant 0 : index
    %54 = vector.load %arg10[%c1_52, %c0_53] : memref<2x128xf32, #tpu.memory_space<vmem>>, vector<1x128xf32>
    %55 = vector.extract_strided_slice %50 {offsets = [0, 0], sizes = [2, 128], strides = [1, 1]} : vector<3x256xf32> to vector<2x128xf32>
    %56 = vector.extract_strided_slice %50 {offsets = [1, 128], sizes = [2, 128], strides = [1, 1]} : vector<3x256xf32> to vector<2x128xf32>
    %57 = arith.addf %55, %56 : vector<2x128xf32>
    %58 = vector.extract_strided_slice %52 {offsets = [0, 0], sizes = [2, 128], strides = [1, 1]} : vector<3x128xf32> to vector<2x128xf32>
    %59 = arith.addf %57, %58 : vector<2x128xf32>
    %60 = vector.broadcast %53 : vector<1x128xf32> to vector<2x128xf32>
    %61 = arith.addf %59, %60 : vector<2x128xf32>
    %cst_54 = arith.constant 2.000000e-01 : f32
    %62 = vector.broadcast %cst_54 : f32 to vector<2x128xf32>
    %63 = arith.mulf %62, %61 : vector<2x128xf32>
    %64 = arith.maximumf %61, %63 : vector<2x128xf32>
    %65 = vector.broadcast %54 : vector<1x128xf32> to vector<2x128xf32>
    %66 = arith.addf %64, %65 : vector<2x128xf32>
    %c1_55 = arith.constant 1 : index
    %c0_56 = arith.constant 0 : index
    %67 = vector.load %arg18[%c1_55, %c0_56] : memref<4x128xf32, #tpu.memory_space<vmem>>, vector<2x128xf32>
    tpu.vector_store %arg18[%c1_55, %c0_56], %66 {strides = array<i32>} : memref<4x128xf32, #tpu.memory_space<vmem>>, vector<2x128xf32>,
    %c0_57 = arith.constant 0 : index
    %c0_58 = arith.constant 0 : index
    %68 = tpu.strided_load %arg18[%c0_57, %c0_58] {strides = array<i32: 2, 1>} : memref<4x128xf32, #tpu.memory_space<vmem>>, vector<2x128xf32>
    %c1_59 = arith.constant 1 : index
    %c0_60 = arith.constant 0 : index
    %69 = tpu.strided_load %arg18[%c1_59, %c0_60] {strides = array<i32: 2, 1>} : memref<4x128xf32, #tpu.memory_space<vmem>>, vector<2x128xf32>
    %c0_61 = arith.constant 0 : index
    %c0_62 = arith.constant 0 : index
    %70 = vector.load %arg11[%c0_61, %c0_62] : memref<128x256xf32, #tpu.memory_space<vmem>>, vector<128x256xf32>
    %cst_63 = arith.constant dense<0.000000e+00> : vector<2x256xf32>
    %71 = tpu.matmul %68, %70, %cst_63 {dimension_numbers = #tpu.dot_dimension_numbers<[1], [0], [0], [1], [0, 0, 1, 1], [], []>} : vector<2x128xf32>, vector<128x256xf32>, vector<2x256xf32> -> vector<2x256xf32>
    %c0_64 = arith.constant 0 : index
    %c0_65 = arith.constant 0 : index
    %72 = vector.load %arg12[%c0_64, %c0_65] : memref<128x128xf32, #tpu.memory_space<vmem>>, vector<128x128xf32>
    %cst_66 = arith.constant dense<0.000000e+00> : vector<2x128xf32>
    %73 = tpu.matmul %69, %72, %cst_66 {dimension_numbers = #tpu.dot_dimension_numbers<[1], [0], [0], [1], [0, 0, 1, 1], [], []>} : vector<2x128xf32>, vector<128x128xf32>, vector<2x128xf32> -> vector<2x128xf32>
    %c0_67 = arith.constant 0 : index
    %c0_68 = arith.constant 0 : index
    %74 = vector.load %arg13[%c0_67, %c0_68] : memref<2x128xf32, #tpu.memory_space<vmem>>, vector<1x128xf32>
    %c1_69 = arith.constant 1 : index
    %c0_70 = arith.constant 0 : index
    %75 = vector.load %arg13[%c1_69, %c0_70] : memref<2x128xf32, #tpu.memory_space<vmem>>, vector<1x128xf32>
    %76 = vector.extract_strided_slice %71 {offsets = [0, 0], sizes = [1, 128], strides = [1, 1]} : vector<2x256xf32> to vector<1x128xf32>
    %77 = vector.extract_strided_slice %71 {offsets = [1, 128], sizes = [1, 128], strides = [1, 1]} : vector<2x256xf32> to vector<1x128xf32>
    %78 = arith.addf %76, %77 : vector<1x128xf32>
    %79 = vector.extract_strided_slice %73 {offsets = [0, 0], sizes = [1, 128], strides = [1, 1]} : vector<2x128xf32> to vector<1x128xf32>
    %80 = arith.addf %78, %79 : vector<1x128xf32>
    %81 = arith.addf %80, %74 : vector<1x128xf32>
    %cst_71 = arith.constant 2.000000e-01 : f32
    %82 = vector.broadcast %cst_71 : f32 to vector<1x128xf32>
    %83 = arith.mulf %82, %81 : vector<1x128xf32>
    %84 = arith.maximumf %81, %83 : vector<1x128xf32>
    %85 = arith.addf %84, %75 : vector<1x128xf32>
    %c0_72 = arith.constant 0 : index
    %c0_73 = arith.constant 0 : index
    %86 = vector.load %arg14[%c0_72, %c0_73] : memref<1x128xf32, #tpu.memory_space<vmem>>, vector<1x128xf32>
    %87 = arith.mulf %85, %86 : vector<1x128xf32>
    %88 = vector.shape_cast %87 : vector<1x128xf32> to vector<1x1x128xf32>
    %cst_74 = arith.constant dense<0.000000e+00> : vector<1xf32>
    %89 = vector.multi_reduction <add>, %88, %cst_74 [1, 2] : vector<1x1x128xf32> to vector<1xf32>
    %90 = vector.shape_cast %89 : vector<1xf32> to vector<1x1x1xf32>
    %91 = vector.extract %90[0, 0, 0] : f32 from vector<1x1x1xf32>
    %92 = vector.broadcast %91 : f32 to vector<1x128xf32>
    %c0_75 = arith.constant 0 : index
    %c0_76 = arith.constant 0 : index
    %c0_77 = arith.constant 0 : index
    %93 = vector.load %arg15[%c0_75, %c0_76, %c0_77] : memref<1x1x128xf32, #tpu.memory_space<vmem>>, vector<1x1x128xf32>
    %94 = vector.shape_cast %93 : vector<1x1x128xf32> to vector<1x128xf32>
    %95 = vector.shape_cast %92 : vector<1x128xf32> to vector<1x1x128xf32>
    tpu.vector_store %arg15[%c0_75, %c0_76, %c0_77], %95 {strides = array<i32>} : memref<1x1x128xf32, #tpu.memory_space<vmem>>, vector<1x1x128xf32>,
    return
  }
  func.func @transform_0(%arg0: i32) -> (i32, i32, i32) {
    %c0_i32 = arith.constant 0 : i32
    %c0_i32_0 = arith.constant 0 : i32
    %c0_i32_1 = arith.constant 0 : i32
    return %arg0, %c0_i32, %c0_i32_0 : i32, i32, i32
  }
  func.func @transform_1(%arg0: i32) -> (i32, i32) {
    %c0_i32 = arith.constant 0 : i32
    %c0_i32_0 = arith.constant 0 : i32
    %c0_i32_1 = arith.constant 0 : i32
    return %c0_i32, %c0_i32_0 : i32, i32
  }
  func.func @transform_2(%arg0: i32) -> (i32, i32) {
    %c0_i32 = arith.constant 0 : i32
    %c0_i32_0 = arith.constant 0 : i32
    %c0_i32_1 = arith.constant 0 : i32
    return %c0_i32, %c0_i32_0 : i32, i32
  }
  func.func @transform_3(%arg0: i32) -> (i32, i32) {
    %c0_i32 = arith.constant 0 : i32
    %c0_i32_0 = arith.constant 0 : i32
    %c0_i32_1 = arith.constant 0 : i32
    return %c0_i32, %c0_i32_0 : i32, i32
  }
  func.func @transform_4(%arg0: i32) -> (i32, i32) {
    %c0_i32 = arith.constant 0 : i32
    %c0_i32_0 = arith.constant 0 : i32
    %c0_i32_1 = arith.constant 0 : i32
    return %c0_i32, %c0_i32_0 : i32, i32
  }
  func.func @transform_5(%arg0: i32) -> (i32, i32) {
    %c0_i32 = arith.constant 0 : i32
    %c0_i32_0 = arith.constant 0 : i32
    %c0_i32_1 = arith.constant 0 : i32
    return %c0_i32, %c0_i32_0 : i32, i32
  }
  func.func @transform_6(%arg0: i32) -> (i32, i32) {
    %c0_i32 = arith.constant 0 : i32
    %c0_i32_0 = arith.constant 0 : i32
    %c0_i32_1 = arith.constant 0 : i32
    return %c0_i32, %c0_i32_0 : i32, i32
  }
  func.func @transform_7(%arg0: i32) -> (i32, i32) {
    %c0_i32 = arith.constant 0 : i32
    %c0_i32_0 = arith.constant 0 : i32
    %c0_i32_1 = arith.constant 0 : i32
    return %c0_i32, %c0_i32_0 : i32, i32
  }
  func.func @transform_8(%arg0: i32) -> (i32, i32) {
    %c0_i32 = arith.constant 0 : i32
    %c0_i32_0 = arith.constant 0 : i32
    %c0_i32_1 = arith.constant 0 : i32
    return %c0_i32, %c0_i32_0 : i32, i32
  }
  func.func @transform_9(%arg0: i32) -> (i32, i32) {
    %c0_i32 = arith.constant 0 : i32
    %c0_i32_0 = arith.constant 0 : i32
    %c0_i32_1 = arith.constant 0 : i32
    return %c0_i32, %c0_i32_0 : i32, i32
  }
  func.func @transform_10(%arg0: i32) -> (i32, i32) {
    %c0_i32 = arith.constant 0 : i32
    %c0_i32_0 = arith.constant 0 : i32
    %c0_i32_1 = arith.constant 0 : i32
    return %c0_i32, %c0_i32_0 : i32, i32
  }
  func.func @transform_11(%arg0: i32) -> (i32, i32) {
    %c0_i32 = arith.constant 0 : i32
    %c0_i32_0 = arith.constant 0 : i32
    %c0_i32_1 = arith.constant 0 : i32
    return %c0_i32, %c0_i32_0 : i32, i32
  }
  func.func @transform_12(%arg0: i32) -> (i32, i32) {
    %c0_i32 = arith.constant 0 : i32
    %c0_i32_0 = arith.constant 0 : i32
    %c0_i32_1 = arith.constant 0 : i32
    return %c0_i32, %c0_i32_0 : i32, i32
  }
  func.func @transform_13(%arg0: i32) -> (i32, i32) {
    %c0_i32 = arith.constant 0 : i32
    %c0_i32_0 = arith.constant 0 : i32
    %c0_i32_1 = arith.constant 0 : i32
    return %c0_i32, %c0_i32_0 : i32, i32
  }
  func.func @transform_14(%arg0: i32) -> (i32, i32, i32) {
    %c0_i32 = arith.constant 0 : i32
    %c0_i32_0 = arith.constant 0 : i32
    %c0_i32_1 = arith.constant 0 : i32
    return %arg0, %c0_i32, %c0_i32_0 : i32, i32, i32
  }
}

</mosaic_0001>

<bundles_post_ra>
// kernel: tile.41
= control target key start
LH: loop header
LB: loop body
LE: loop exit
PB: predicated region body
PF: predicated region fallthrough
CT: control target
= control target key end

     0   :  { %s22_s0 = inlined_call_operand.vmem [shape: f32[32], index: 0, kind: input, shape index: {}]   ;;  %s23_s1 = inlined_call_operand.vmem [shape: f32[4,32], index: 1, kind: output, shape index: {}]  }
   0x1   :  { %v4_v0 = vld [vmem:[%s22_s0] ss:$0 sm:$0xff] }
   0x2   :  { %5 = vst [vmem:[%s23_s1] sm:$0xf] %v4_v0 }

// kernel: tile.43
= control target key start
LH: loop header
LB: loop body
LE: loop exit
PB: predicated region body
PF: predicated region fallthrough
CT: control target
= control target key end

     0   :  { %vm8_vm0 = vcmask 261120   ;;  %s40_s8 = smov 32   ;;  %s41_s9 = smov 64   ;;  %vm14_vm1 = vcmask 1048320   ;;  %vm20_vm2 = vcmask 785920   ;;  %vm26_vm3 = vcmask 523520   ;;  %s58_s0 = inlined_call_operand.vmem [shape: f32[4,32], index: 0, kind: input, shape index: {}]   ;;  %s59_s1 = inlined_call_operand.vmem [shape: f32[1,128], index: 1, kind: output, shape index: {}]  }
   0x1   :  { %v5_v0 = vld [vmem:[%s58_s0] sm:$0xf]  ;;  %s39_s0 = smov 96  }
   0x2   :  { %6 = vst [vmem:[#allocation1] sm:$0xf] %v5_v0 }
   0x9   :  { %v11_v1 = vld [vmem:[#allocation1 + $0x3] sm:$0x1]   ;;  %v23_v2 = vld [vmem:[#allocation1 + $0x1] sm:$0x1]   ;;  %v7_v3 = vld [vmem:[#allocation1] sm:$0x1]  }
   0xa   :  { %12 = vrot.lane.b32.xlu0 %v11_v1, %s39_s0  ;;  %24 = vrot.lane.b32.xlu1 %v23_v2, %s40_s8  ;;  %v17_v4 = vld [vmem:[#allocation1 + $0x2] sm:$0x1]   ;;  %9 = vst.msk [vmem:[#allocation0] sm:$0x1] %vm8_vm0, %v7_v3  }
   0xe   :  { %18 = vrot.lane.b32.xlu0 %v17_v4, %s41_s9 }
  0x7c   :  { %v13_v5 = vpop.permute.xlu0 %12   ;;  %v25_v6 = vpop.permute.xlu1 %24  }
  0x7d   :  { %15 = vst.msk [vmem:[#allocation0] sm:$0x1] %vm14_vm1, %v13_v5  }
  0x80   :  { %v19_v7 = vpop.permute.xlu0 %18  }
  0x81   :  { %21 = vst.msk [vmem:[#allocation0] sm:$0x1] %vm20_vm2, %v19_v7  }
  0x82   :  { %27 = vst.msk [vmem:[#allocation0] sm:$0x1] %vm26_vm3, %v25_v6  }
  0x89   :  { %v32_v8 = vld [vmem:[#allocation0] sm:$0x1] }
  0x8a   :  { %35 = vst [vmem:[%s59_s1] sm:$0x1] %v32_v8 }

// kernel: tile.51
= control target key start
LH: loop header
LB: loop body
LE: loop exit
PB: predicated region body
PF: predicated region fallthrough
CT: control target
= control target key end

     0   :  { %s22_s0 = inlined_call_operand.vmem [shape: f32[64], index: 0, kind: input, shape index: {}]   ;;  %s23_s1 = inlined_call_operand.vmem [shape: f32[2,64], index: 1, kind: output, shape index: {}]  }
   0x1   :  { %v4_v0 = vld [vmem:[%s22_s0] ss:$0 sm:$0xff] }
   0x2   :  { %5 = vst [vmem:[%s23_s1] sm:$0x3] %v4_v0 }

// kernel: tile.53
= control target key start
LH: loop header
LB: loop body
LE: loop exit
PB: predicated region body
PF: predicated region fallthrough
CT: control target
= control target key end

     0   :  { %vm8_vm0 = vcmask 523264   ;;  %vm14_vm1 = vcmask 1048064   ;;  %s42_s0 = inlined_call_operand.vmem [shape: f32[2,64], index: 0, kind: input, shape index: {}]   ;;  %s43_s1 = inlined_call_operand.vmem [shape: f32[1,128], index: 1, kind: output, shape index: {}]  }
   0x1   :  { %v5_v0 = vld [vmem:[%s42_s0] sm:$0x3]  ;;  %s25_s0 = smov 64  }
   0x2   :  { %6 = vst [vmem:[#allocation1] sm:$0x3] %v5_v0 }
   0x9   :  { %v11_v1 = vld [vmem:[#allocation1 + $0x1] sm:$0x1]   ;;  %v7_v2 = vld [vmem:[#allocation1] sm:$0x1]  }
   0xa   :  { %12 = vrot.lane.b32.xlu0 %v11_v1, %s25_s0  ;;  %9 = vst.msk [vmem:[#allocation0] sm:$0x1] %vm8_vm0, %v7_v2  }
  0x7c   :  { %v13_v3 = vpop.permute.xlu0 %12  }
  0x7d   :  { %15 = vst.msk [vmem:[#allocation0] sm:$0x1] %vm14_vm1, %v13_v3  }
  0x84   :  { %v20_v4 = vld [vmem:[#allocation0] sm:$0x1] }
  0x85   :  { %23 = vst [vmem:[%s43_s1] sm:$0x1] %v20_v4 }

// kernel: tile.32
= control target key start
LH: loop header
LB: loop body
LE: loop exit
PB: predicated region body
PF: predicated region fallthrough
CT: control target
= control target key end

     0   :  { %s22_s0 = inlined_call_operand.vmem [shape: f32[16], index: 0, kind: input, shape index: {}]   ;;  %s23_s1 = inlined_call_operand.vmem [shape: f32[8,16], index: 1, kind: output, shape index: {}]  }
   0x1   :  { %v4_v0 = vld [vmem:[%s22_s0] ss:$0 sm:$0xff] }
   0x2   :  { %5 = vst [vmem:[%s23_s1] sm:$0xff] %v4_v0 }

// kernel: tile.33
= control target key start
LH: loop header
LB: loop body
LE: loop exit
PB: predicated region body
PF: predicated region fallthrough
CT: control target
= control target key end

     0   :  { %s69_s10 = smov 112   ;;  %s70_s11 = smov 80   ;;  %vm3_vm0 = vcmask 130048   ;;  %vm9_vm1 = vcmask 1048448   ;;  %vm15_vm2 = vcmask 917248   ;;  %vm21_vm3 = vcmask 786048   ;;  %s113_s0 = inlined_call_operand.vmem [shape: f32[8,16], index: 0, kind: input, shape index: {}]   ;;  %s114_s1 = inlined_call_operand.vmem [shape: f32[1,128], index: 1, kind: output, shape index: {}]  }
   0x1   :  { %v55_v0 = vld [vmem:[%s113_s0 + $0x7] sm:$0x1]   ;;  %v57_v1 = vld [vmem:[%s113_s0 + $0x5] sm:$0x1]   ;;  %v56_v2 = vld [vmem:[%s113_s0 + $0x6] sm:$0x1]  }
   0x2   :  { %7 = vrot.lane.b32.xlu0 %v55_v0, %s69_s10  ;;  %19 = vrot.lane.b32.xlu1 %v57_v1, %s70_s11  ;;  %v58_v3 = vld [vmem:[%s113_s0 + $0x4] sm:$0x1]   ;;  %v2_v4 = vld [vmem:[%s113_s0] sm:$0x1]   ;;  %s71_s18 = smov 96   ;;  %s72_s19 = smov 64  }
   0x3   :  { %4 = vst.msk [vmem:[#allocation0] sm:$0x1] %vm3_vm0, %v2_v4   ;;  %v59_v5 = vld [vmem:[%s113_s0 + $0x3] sm:$0x1]   ;;  %v60_v6 = vld [vmem:[%s113_s0 + $0x2] sm:$0x1]  }
   0x4   :  { %s73_s24 = smov 48   ;;  %s74_s25 = smov 32   ;;  %v61_v7 = vld [vmem:[%s113_s0 + $0x1] sm:$0x1]   ;;  %vm27_vm4 = vcmask 654848   ;;  %vm33_vm5 = vcmask 523648  }
   0x5   :  { %s75_s0 = smov 16   ;;  %vm39_vm6 = vcmask 392448   ;;  %vm45_vm7 = vcmask 261248  }
   0x6   :  { %13 = vrot.lane.b32.xlu0 %v56_v2, %s71_s18  ;;  %25 = vrot.lane.b32.xlu1 %v58_v3, %s72_s19 }
   0xa   :  { %31 = vrot.lane.b32.xlu0 %v59_v5, %s73_s24  ;;  %37 = vrot.lane.b32.xlu1 %v60_v6, %s74_s25 }
   0xe   :  { %43 = vrot.lane.b32.xlu0 %v61_v7, %s75_s0 }
  0x74   :  { %v8_v8 = vpop.permute.xlu0 %7   ;;  %v20_v9 = vpop.permute.xlu1 %19  }
  0x75   :  { %10 = vst.msk [vmem:[#allocation0] sm:$0x1] %vm9_vm1, %v8_v8  }
  0x78   :  { %v14_v10 = vpop.permute.xlu0 %13   ;;  %v26_v11 = vpop.permute.xlu1 %25  }
  0x79   :  { %16 = vst.msk [vmem:[#allocation0] sm:$0x1] %vm15_vm2, %v14_v10  }
  0x7a   :  { %22 = vst.msk [vmem:[#allocation0] sm:$0x1] %vm21_vm3, %v20_v9  }
  0x7b   :  { %28 = vst.msk [vmem:[#allocation0] sm:$0x1] %vm27_vm4, %v26_v11  }
  0x7c   :  { %v32_v12 = vpop.permute.xlu0 %31   ;;  %v38_v13 = vpop.permute.xlu1 %37  }
  0x7d   :  { %34 = vst.msk [vmem:[#allocation0] sm:$0x1] %vm33_vm5, %v32_v12  }
  0x7e   :  { %40 = vst.msk [vmem:[#allocation0] sm:$0x1] %vm39_vm6, %v38_v13  }
  0x80   :  { %v44_v14 = vpop.permute.xlu0 %43  }
  0x81   :  { %46 = vst.msk [vmem:[#allocation0] sm:$0x1] %vm45_vm7, %v44_v14  }
  0x88   :  { %v51_v15 = vld [vmem:[#allocation0] sm:$0x1] }
  0x89   :  { %54 = vst [vmem:[%s114_s1] sm:$0x1] %v51_v15 }

// kernel: dc_discriminator_forward.1
= control target key start
LH: loop header
LB: loop body
LE: loop exit
PB: predicated region body
PF: predicated region fallthrough
CT: control target
= control target key end

     0   :  { %s1672_s29 = smov 0   ;;  %s2294_s0 = inlined_call_operand.vmem [shape: f32[2,18,64], index: 0, kind: input, shape index: {}]   ;;  %s2295_s1 = inlined_call_operand.vmem [shape: f32[64,256], index: 1, kind: input, shape index: {}]   ;;  %s2296_s2 = inlined_call_operand.vmem [shape: f32[64,128], index: 2, kind: input, shape index: {}]   ;;  %s2297_s3 = inlined_call_operand.vmem [shape: f32[2,128], index: 3, kind: input, shape index: {}]   ;;  %s2298_s4 = inlined_call_operand.vmem [shape: f32[128,256], index: 4, kind: input, shape index: {}]   ;;  %s2299_s5 = inlined_call_operand.vmem [shape: f32[128,128], index: 5, kind: input, shape index: {}]   ;;  %s2300_s6 = inlined_call_operand.vmem [shape: f32[2,128], index: 6, kind: input, shape index: {}]   ;;  %s2301_s7 = inlined_call_operand.vmem [shape: f32[128,256], index: 7, kind: input, shape index: {}]   ;;  %s2302_s8 = inlined_call_operand.vmem [shape: f32[128,128], index: 8, kind: input, shape index: {}]   ;;  %s2303_s9 = inlined_call_operand.vmem [shape: f32[2,128], index: 9, kind: input, shape index: {}]   ;;  %s2304_s10 = inlined_call_operand.vmem [shape: f32[128,256], index: 10, kind: input, shape index: {}]   ;;  %s2305_s11 = inlined_call_operand.vmem [shape: f32[128,128], index: 11, kind: input, shape index: {}]   ;;  %s2306_s12 = inlined_call_operand.vmem [shape: f32[2,128], index: 12, kind: input, shape index: {}]   ;;  %s2307_s13 = inlined_call_operand.vmem [shape: f32[1,128], index: 13, kind: input, shape index: {}]   ;;  %s2308_s14 = inlined_call_operand.vmem [shape: f32[2,1,128], index: 14, kind: output, shape index: {}]  }
   0x1 LB: > { %s1369_s30 = sadd.s32 4294967295, %s1593_s29   ;;  %p1373_p0 = scmp.ge.s32.totalorder %s1593_s29, 1  ;;  %s1593_s29 = sphi %s1672_s29, %s24_s29  }
   0x2   : > { %p412_p1 = scmp.lt.s32.totalorder %s1593_s29, 3 }
   0x4   : > { %p413_p2 = pnand %p1373_p0, %p412_p1 }
   0x5   : > { %p1689_p3 = scmp.lt.s32.totalorder (!%p413_p2), %s1369_s30, 1 }
   0x6   : > { %416 = sbr.rel (%p413_p2) target bundleno = 1096 (0x448), region = 76 }
   0xb   : > { %v490_v0 = vld [vmem:[%s2295_s1 + $0x78] sm:$0xff]  ;;  %v489_v1 = vld [vmem:[%s2295_s1 + $0x70] sm:$0xff]  ;;  %v488_v2 = vld [vmem:[%s2295_s1 + $0x68] sm:$0xff]  ;;  %v1595_v4 = vmov 0.0   ;;  %s2311_s30 = smov (!%p1689_p3, %s1369_s30), 1  ;;  %vm491_vm0 = vcmask 523264  }
   0xc   : > { %514 = vmatprep.subr.mxu0 %v490_v0  ;;  %v487_v3 = vld [vmem:[%s2295_s1 + $0x60] sm:$0xff]  ;;  %562 = vmatprep.mubr.f32.mxu0 %v1595_v4  ;;  %464 = vst [vmem:[#allocation2] sm:$0xff] %v1595_v4  ;;  %465 = vst [vmem:[#allocation2 + $0x8] sm:$0x3] %v1595_v4  ;;  %v486_v5 = vld [vmem:[%s2295_s1 + $0x58] sm:$0xff]  ;;  %s1574_s16 = smul.u32 24, %s2311_s30 }
   0xd   : > { %466 = vst [vmem:[#allocation3] sm:$0x3f] %v1595_v4  ;;  %467 = vst [vmem:[#allocation4] sm:$0xf] %v1595_v4  ;;  %515 = vmatpush1.msra.mxu0 %v489_v1  ;;  %v581_v6 = vld [vmem:[%s2296_s2 + $0x38] sm:$0xff]  ;;  %v485_v7 = vld [vmem:[%s2295_s1 + $0x50] sm:$0xff] }
   0xe   : > { %516 = vmatprep.subr.mxu0 %v488_v2  ;;  %1450 = vmatprep.subr.mxu1 %v581_v6  ;;  %v580_v8 = vld [vmem:[%s2296_s2 + $0x30] sm:$0xff]  ;;  %v484_v9 = vld [vmem:[%s2295_s1 + $0x48] sm:$0xff]  ;;  %v483_v11 = vld [vmem:[%s2295_s1 + $0x40] sm:$0xff]  ;;  %s460_s18 = scalar_lea.vmem %s2294_s0, %s1574_s16  ;;  %vm1596_vm1 = vmmov 0   ;;  %vm665_vm2 = vcmask 1046528   ;;  %vm1309_vm3 = vcmask 1040384   ;;  %s463_s16 = scalar_lea.vmem %s2308_s14, %s2311_s30 }
   0xf   : > { %517 = vmatpush1.msra.mxu0 %v487_v3  ;;  %1451 = vmatpush3.msra.mxu1 %v581_v6  ;;  %v579_v10 = vld [vmem:[%s2296_s2 + $0x28] sm:$0xff]  ;;  %v482_v12 = vld [vmem:[%s2295_s1 + $0x38] sm:$0xff]  ;;  %v578_v13 = vld [vmem:[%s2296_s2 + $0x20] sm:$0xff] }
  0x10   : > { %518 = vmatprep.subr.mxu0 %v486_v5  ;;  %1452 = vmatprep.subr.mxu1 %v580_v8  ;;  %v481_v14 = vld [vmem:[%s2295_s1 + $0x30] sm:$0xff]  ;;  %v480_v15 = vld [vmem:[%s2295_s1 + $0x28] sm:$0xff]  ;;  %v577_v16 = vld [vmem:[%s2296_s2 + $0x18] sm:$0xff] }
  0x11   : > { %519 = vmatpush1.msra.mxu0 %v485_v7  ;;  %1453 = vmatpush3.msra.mxu1 %v580_v8  ;;  %v479_v17 = vld [vmem:[%s2295_s1 + $0x20] sm:$0xff]  ;;  %v478_v18 = vld [vmem:[%s2295_s1 + $0x18] sm:$0xff]  ;;  %v576_v19 = vld [vmem:[%s2296_s2 + $0x10] sm:$0xff] }
  0x12   : > { %520 = vmatprep.subr.mxu0 %v484_v9  ;;  %1454 = vmatprep.subr.mxu1 %v579_v10  ;;  %v477_v20 = vld [vmem:[%s2295_s1 + $0x10] sm:$0xff]  ;;  %v476_v21 = vld [vmem:[%s2295_s1 + $0x8] sm:$0xff]  ;;  %v475_v23 = vld [vmem:[%s2295_s1] sm:$0xff] }
  0x13   : > { %521 = vmatpush1.msra.mxu0 %v483_v11  ;;  %1455 = vmatpush3.msra.mxu1 %v579_v10  ;;  %v575_v22 = vld [vmem:[%s2296_s2 + $0x8] sm:$0xff]  ;;  %v574_v25 = vld [vmem:[%s2296_s2] sm:$0xff]  ;;  %v714_v27 = vld [vmem:[%s2298_s4 + $0xf8] sm:$0xff] }
  0x14   : > { %522 = vmatprep.subr.mxu0 %v482_v12  ;;  %1456 = vmatprep.subr.mxu1 %v578_v13  ;;  %v468_v24 = vld [vmem:[%s460_s18] ss:$2 sm:$0xff]  ;;  %v1376_v26 = vld [vmem:[%s460_s18 + $0x1] ss:$2 sm:$0xff]  ;;  %v801_v30 = vld [vmem:[%s2299_s5 + $0x78] sm:$0xff] }
  0x15   : > { %523 = vmatpush1.msra.mxu0 %v481_v14  ;;  %1457 = vmatpush3.msra.mxu1 %v578_v13  ;;  %v1377_v28 = vld [vmem:[%s460_s18 + $0x11] ss:$2 sm:$0x1]  ;;  %v1375_v29 = vld [vmem:[%s460_s18 + $0x10] ss:$2 sm:$0x1] }
  0x16   : > { %524 = vmatprep.subr.mxu0 %v480_v15  ;;  %1458 = vmatprep.subr.mxu1 %v577_v16  ;;  %v713_v31 = vld [vmem:[%s2298_s4 + $0xf0] sm:$0xff]  ;;  %v712_v32 = vld [vmem:[%s2298_s4 + $0xe8] sm:$0xff]  ;;  %v711_v34 = vld [vmem:[%s2298_s4 + $0xe0] sm:$0xff] }
  0x17   : > { %525 = vmatpush1.msra.mxu0 %v479_v17  ;;  %1459 = vmatpush3.msra.mxu1 %v577_v16  ;;  %v800_v33 = vld [vmem:[%s2299_s5 + $0x70] sm:$0xff]  ;;  %v710_v35 = vld [vmem:[%s2298_s4 + $0xd8] sm:$0xff]  ;;  %v799_v37 = vld [vmem:[%s2299_s5 + $0x68] sm:$0xff] }
  0x18   : > { %526 = vmatprep.subr.mxu0 %v478_v18  ;;  %1460 = vmatprep.subr.mxu1 %v576_v19  ;;  %v709_v36 = vld [vmem:[%s2298_s4 + $0xd0] sm:$0xff]  ;;  %v708_v38 = vld [vmem:[%s2298_s4 + $0xc8] sm:$0xff]  ;;  %v707_v39 = vld [vmem:[%s2298_s4 + $0xc0] sm:$0xff] }
  0x19   : > { %527 = vmatpush1.msra.mxu0 %v477_v20  ;;  %1461 = vmatpush3.msra.mxu1 %v576_v19  ;;  %v798_v40 = vld [vmem:[%s2299_s5 + $0x60] sm:$0xff]  ;;  %v706_v41 = vld [vmem:[%s2298_s4 + $0xb8] sm:$0xff]  ;;  %v705_v42 = vld [vmem:[%s2298_s4 + $0xb0] sm:$0xff] }
  0x1a   : > { %528 = vmatprep.subr.mxu0 %v476_v21  ;;  %1462 = vmatprep.subr.mxu1 %v575_v22  ;;  %v797_v43 = vld [vmem:[%s2299_s5 + $0x58] sm:$0xff]  ;;  %v704_v44 = vld [vmem:[%s2298_s4 + $0xa8] sm:$0xff]  ;;  %v703_v45 = vld [vmem:[%s2298_s4 + $0xa0] sm:$0xff] }
  0x1b   : > { %529 = vmatpush1.msra.mxu0 %v475_v23  ;;  %1463 = vmatpush3.msra.mxu1 %v575_v22  ;;  %v796_v46 = vld [vmem:[%s2299_s5 + $0x50] sm:$0xff]  ;;  %v702_v47 = vld [vmem:[%s2298_s4 + $0x98] sm:$0xff]  ;;  %v795_v49 = vld [vmem:[%s2299_s5 + $0x48] sm:$0xff] }
  0x1c   : > { %1378 = vmatmul.mubr.msk.f32.vlgmr.msra.gmra.mxu0 %vm491_vm0, %v468_v24  ;;  %1464 = vmatprep.subr.mxu1 %v574_v25  ;;  %v701_v48 = vld [vmem:[%s2298_s4 + $0x90] sm:$0xff]  ;;  %v700_v50 = vld [vmem:[%s2298_s4 + $0x88] sm:$0xff]  ;;  %v699_v51 = vld [vmem:[%s2298_s4 + $0x80] sm:$0xff] }
  0x1d   : > { %568 = vmatprep.mubr.f32.mxu0 %v1595_v4  ;;  %1465 = vmatpush3.msra.mxu1 %v574_v25  ;;  %v794_v52 = vld [vmem:[%s2299_s5 + $0x40] sm:$0xff]  ;;  %v698_v53 = vld [vmem:[%s2298_s4 + $0x78] sm:$0xff]  ;;  %v697_v54 = vld [vmem:[%s2298_s4 + $0x70] sm:$0xff] }
  0x1e   : > { %1466 = vmatprep.mubr.msk.f32.mxu1 %vm491_vm0, %v1376_v26  ;;  %715 = vmatprep.subr.mxu0 %v714_v27  ;;  %v793_v55 = vld [vmem:[%s2299_s5 + $0x38] sm:$0xff]  ;;  %v696_v56 = vld [vmem:[%s2298_s4 + $0x68] sm:$0xff]  ;;  %v695_v57 = vld [vmem:[%s2298_s4 + $0x60] sm:$0xff] }
  0x1f   : > { %1467 = vmatmul.mubr.msk.f32.vlgmr.msra.gmra.mxu1 %vm491_vm0, %v1377_v28  ;;  %1469 = vmatprep.subr.mxu1 %v1595_v4  ;;  %v792_v58 = vld [vmem:[%s2299_s5 + $0x30] sm:$0xff]  ;;  %v694_v59 = vld [vmem:[%s2298_s4 + $0x58] sm:$0xff]  ;;  %v791_v61 = vld [vmem:[%s2299_s5 + $0x28] sm:$0xff] }
  0x20   : > { %1379 = vmatmul.mubr.msk.f32.gmra.mxu0 %vm491_vm0, %v1375_v29  ;;  %1470 = vmatpush3.msra.mxu1 %v801_v30  ;;  %v693_v60 = vld [vmem:[%s2298_s4 + $0x50] sm:$0xff]  ;;  %v692_v62 = vld [vmem:[%s2298_s4 + $0x48] sm:$0xff]  ;;  %v691_v63 = vld [vmem:[%s2298_s4 + $0x40] sm:$0xff] }
  0x21   : > { %716 = vmatpush1.msra.mxu0 %v713_v31  ;;  %1471 = vmatprep.subr.mxu1 %v1595_v4  ;;  %v790_v0 = vld [vmem:[%s2299_s5 + $0x20] sm:$0xff]  ;;  %v690_v1 = vld [vmem:[%s2298_s4 + $0x38] sm:$0xff]  ;;  %v689_v2 = vld [vmem:[%s2298_s4 + $0x30] sm:$0xff] }
  0x22   : > { %717 = vmatprep.subr.mxu0 %v712_v32  ;;  %1472 = vmatpush3.msra.mxu1 %v800_v33  ;;  %v789_v3 = vld [vmem:[%s2299_s5 + $0x18] sm:$0xff]  ;;  %v688_v5 = vld [vmem:[%s2298_s4 + $0x28] sm:$0xff]  ;;  %v687_v6 = vld [vmem:[%s2298_s4 + $0x20] sm:$0xff] }
  0x23   : > { %718 = vmatpush1.msra.mxu0 %v711_v34  ;;  %1473 = vmatprep.subr.mxu1 %v1595_v4  ;;  %v788_v7 = vld [vmem:[%s2299_s5 + $0x10] sm:$0xff]  ;;  %v686_v8 = vld [vmem:[%s2298_s4 + $0x18] sm:$0xff]  ;;  %v787_v10 = vld [vmem:[%s2299_s5 + $0x8] sm:$0xff] }
  0x24   : > { %779 = vmatprep.mubr.f32.mxu0 %v1595_v4  ;;  %719 = vmatprep.subr.mxu0 %v710_v35  ;;  %v685_v9 = vld [vmem:[%s2298_s4 + $0x10] sm:$0xff]  ;;  %v684_v11 = vld [vmem:[%s2298_s4 + $0x8] sm:$0xff]  ;;  %v683_v12 = vld [vmem:[%s2298_s4] sm:$0xff] }
  0x25   : > { %720 = vmatpush1.msra.mxu0 %v709_v36  ;;  %1474 = vmatpush3.msra.mxu1 %v799_v37  ;;  %v786_v13 = vld [vmem:[%s2299_s5] sm:$0xff]  ;;  %v926_v14 = vld [vmem:[%s2301_s7 + $0xf8] sm:$0xff]  ;;  %v925_v30 = vld [vmem:[%s2301_s7 + $0xf0] sm:$0xff] }
  0x26   : > { %721 = vmatprep.subr.mxu0 %v708_v38  ;;  %1475 = vmatprep.subr.mxu1 %v1595_v4  ;;  %v1382_v25 = vld [vmem:[%s2297_s3] ss:$0 sm:$0xff]  ;;  %v1013_v31 = vld [vmem:[%s2302_s8 + $0x78] sm:$0xff]  ;;  %v924_v32 = vld [vmem:[%s2301_s7 + $0xe8] sm:$0xff] }
  0x27   : > { %722 = vmatpush1.msra.mxu0 %v707_v39  ;;  %1476 = vmatpush3.msra.mxu1 %v798_v40  ;;  %v923_v35 = vld [vmem:[%s2301_s7 + $0xe0] sm:$0xff]  ;;  %v1012_v36 = vld [vmem:[%s2302_s8 + $0x70] sm:$0xff]  ;;  %v922_v37 = vld [vmem:[%s2301_s7 + $0xd8] sm:$0xff] }
  0x28   : > { %723 = vmatprep.subr.mxu0 %v706_v41  ;;  %1477 = vmatprep.subr.mxu1 %v1595_v4  ;;  %v921_v38 = vld [vmem:[%s2301_s7 + $0xd0] sm:$0xff]  ;;  %v1011_v39 = vld [vmem:[%s2302_s8 + $0x68] sm:$0xff]  ;;  %v919_v41 = vld [vmem:[%s2301_s7 + $0xc0] sm:$0xff] }
  0x29   : > { %724 = vmatpush1.msra.mxu0 %v705_v42  ;;  %1478 = vmatpush3.msra.mxu1 %v797_v43  ;;  %v920_v40 = vld [vmem:[%s2301_s7 + $0xc8] sm:$0xff]  ;;  %v1010_v42 = vld [vmem:[%s2302_s8 + $0x60] sm:$0xff]  ;;  %v918_v43 = vld [vmem:[%s2301_s7 + $0xb8] sm:$0xff] }
  0x2a   : > { %725 = vmatprep.subr.mxu0 %v704_v44  ;;  %1479 = vmatprep.subr.mxu1 %v1595_v4  ;;  %v917_v44 = vld [vmem:[%s2301_s7 + $0xb0] sm:$0xff] }
  0x2b   : > { %726 = vmatpush1.msra.mxu0 %v703_v45  ;;  %1480 = vmatpush3.msra.mxu1 %v796_v46  ;;  %v1009_v45 = vld [vmem:[%s2302_s8 + $0x58] sm:$0xff]  ;;  %v916_v46 = vld [vmem:[%s2301_s7 + $0xa8] sm:$0xff] }
  0x2c   : > { %727 = vmatprep.subr.mxu0 %v702_v47  ;;  %1481 = vmatprep.subr.mxu1 %v1595_v4  ;;  %v915_v47 = vld [vmem:[%s2301_s7 + $0xa0] sm:$0xff] }
  0x2d   : > { %728 = vmatpush1.msra.mxu0 %v701_v48  ;;  %1482 = vmatpush3.msra.mxu1 %v795_v49  ;;  %v1008_v48 = vld [vmem:[%s2302_s8 + $0x50] sm:$0xff]  ;;  %v914_v49 = vld [vmem:[%s2301_s7 + $0x98] sm:$0xff] }
  0x2e   : > { %729 = vmatprep.subr.mxu0 %v700_v50  ;;  %1483 = vmatprep.subr.mxu1 %v1595_v4  ;;  %v913_v50 = vld [vmem:[%s2301_s7 + $0x90] sm:$0xff] }
  0x2f   : > { %730 = vmatpush1.msra.mxu0 %v699_v51  ;;  %1484 = vmatpush3.msra.mxu1 %v794_v52  ;;  %v1007_v51 = vld [vmem:[%s2302_s8 + $0x48] sm:$0xff] }
  0x30   : > { %731 = vmatprep.subr.mxu0 %v698_v53  ;;  %1485 = vmatprep.subr.mxu1 %v1595_v4  ;;  %v912_v52 = vld [vmem:[%s2301_s7 + $0x88] sm:$0xff]  ;;  %v911_v53 = vld [vmem:[%s2301_s7 + $0x80] sm:$0xff] }
  0x31   : > { %732 = vmatpush1.msra.mxu0 %v697_v54  ;;  %1486 = vmatpush3.msra.mxu1 %v793_v55  ;;  %v1006_v54 = vld [vmem:[%s2302_s8 + $0x40] sm:$0xff]  ;;  %v910_v55 = vld [vmem:[%s2301_s7 + $0x78] sm:$0xff] }
  0x32   : > { %733 = vmatprep.subr.mxu0 %v696_v56  ;;  %1487 = vmatprep.subr.mxu1 %v1595_v4  ;;  %v909_v56 = vld [vmem:[%s2301_s7 + $0x70] sm:$0xff] }
  0x33   : > { %734 = vmatpush1.msra.mxu0 %v695_v57  ;;  %1488 = vmatpush3.msra.mxu1 %v792_v58  ;;  %v1005_v57 = vld [vmem:[%s2302_s8 + $0x38] sm:$0xff]  ;;  %v908_v58 = vld [vmem:[%s2301_s7 + $0x68] sm:$0xff] }
  0x34   : > { %735 = vmatprep.subr.mxu0 %v694_v59  ;;  %1489 = vmatprep.subr.mxu1 %v1595_v4  ;;  %v907_v59 = vld [vmem:[%s2301_s7 + $0x60] sm:$0xff] }
  0x35   : > { %736 = vmatpush1.msra.mxu0 %v693_v60  ;;  %1490 = vmatpush3.msra.mxu1 %v791_v61  ;;  %v1004_v60 = vld [vmem:[%s2302_s8 + $0x30] sm:$0xff]  ;;  %v906_v61 = vld [vmem:[%s2301_s7 + $0x58] sm:$0xff] }
  0x36   : > { %737 = vmatprep.subr.mxu0 %v692_v62  ;;  %1491 = vmatprep.subr.mxu1 %v1595_v4  ;;  %v905_v62 = vld [vmem:[%s2301_s7 + $0x50] sm:$0xff] }
  0x37   : > { %738 = vmatpush1.msra.mxu0 %v691_v63  ;;  %1492 = vmatpush3.msra.mxu1 %v790_v0  ;;  %v1003_v63 = vld [vmem:[%s2302_s8 + $0x28] sm:$0xff] }
  0x38   : > { %739 = vmatprep.subr.mxu0 %v690_v1  ;;  %1493 = vmatprep.subr.mxu1 %v1595_v4  ;;  %v904_v0 = vld [vmem:[%s2301_s7 + $0x48] sm:$0xff]  ;;  %v903_v1 = vld [vmem:[%s2301_s7 + $0x40] sm:$0xff] }
  0x39   : > { %740 = vmatpush1.msra.mxu0 %v689_v2  ;;  %1494 = vmatpush3.msra.mxu1 %v789_v3  ;;  %v1002_v2 = vld [vmem:[%s2302_s8 + $0x20] sm:$0xff]  ;;  %v902_v3 = vld [vmem:[%s2301_s7 + $0x38] sm:$0xff] }
  0x3a   : > { %741 = vmatprep.subr.mxu0 %v688_v5  ;;  %1495 = vmatprep.subr.mxu1 %v1595_v4  ;;  %v901_v5 = vld [vmem:[%s2301_s7 + $0x30] sm:$0xff] }
  0x3b   : > { %742 = vmatpush1.msra.mxu0 %v687_v6  ;;  %1496 = vmatpush3.msra.mxu1 %v788_v7  ;;  %v1001_v6 = vld [vmem:[%s2302_s8 + $0x18] sm:$0xff]  ;;  %v900_v7 = vld [vmem:[%s2301_s7 + $0x28] sm:$0xff] }
  0x3c   : > { %743 = vmatprep.subr.mxu0 %v686_v8  ;;  %1497 = vmatprep.subr.mxu1 %v1595_v4  ;;  %v899_v8 = vld [vmem:[%s2301_s7 + $0x20] sm:$0xff] }
  0x3d   : > { %744 = vmatpush1.msra.mxu0 %v685_v9  ;;  %1498 = vmatpush3.msra.mxu1 %v787_v10  ;;  %v1000_v9 = vld [vmem:[%s2302_s8 + $0x10] sm:$0xff]  ;;  %v898_v10 = vld [vmem:[%s2301_s7 + $0x18] sm:$0xff] }
  0x3e   : > { %745 = vmatprep.subr.mxu0 %v684_v11  ;;  %1499 = vmatprep.subr.mxu1 %v1595_v4  ;;  %v897_v11 = vld [vmem:[%s2301_s7 + $0x10] sm:$0xff] }
  0x3f   : > { %746 = vmatpush1.msra.mxu0 %v683_v12  ;;  %1500 = vmatpush3.msra.mxu1 %v786_v13  ;;  %v999_v12 = vld [vmem:[%s2302_s8 + $0x8] sm:$0xff] }
  0x40   : > { %1501 = vmatprep.mubr.msk.f32.mxu1 %vm1596_vm1, %v1595_v4  ;;  %1504 = vmatprep.subr.mxu1 %v1595_v4  ;;  %v896_v13 = vld [vmem:[%s2301_s7 + $0x8] sm:$0xff] }
  0x41   : > { %927 = vmatprep.subr.mxu0 %v926_v14  ;;  %v895_v14 = vld [vmem:[%s2301_s7] sm:$0xff] }
  0xdc   : > { %v564_v15 = vpop.f32.mrf.mxu0 }
  0xde   : > { %v566_v16 = vpop.f32.mrf.mxu0 }
  0xdf   : > { %v1468_v17 = vpop.f32.mrf.mxu1  ;;  %v666_v20 = vrot.slane %v566_v16, 1  ;;  %v1138_v16 = vld [vmem:[%s2304_s10 + $0xf8] sm:$0xff] }
  0xe0   : > { %v570_v18 = vpop.f32.mrf.mxu0 }
  0xe1   : > { %v654_v24 = vpop.f32.mrf.mxu1 }
  0xe2   : > { %v571_v19 = vpop.f32.mrf.mxu0 }
  0xe3   : > { %v667_v21 = vrot.slane %v571_v19, 1 }
  0xe5   : > { %v668_v22 = vsel %vm665_vm2, %v666_v20, %v667_v21 }
  0xe6   : > { %v670_v23 = vadd.f32 %v668_v22, %v564_v15  ;;  %v998_v15 = vld [vmem:[%s2302_s8] sm:$0xff] }
  0xe8   : > { %v671_v26 = vadd.f32 %v670_v23, %v654_v24  ;;  %v1383_v23 = vld [vmem:[%s2300_s6] ss:$0 sm:$0xff] }
  0xea   : > { %v676_v27 = vadd.f32 %v1382_v25, %v671_v26 }
  0xec   : > { %v677_v28 = vmul.f32 0.2, %v676_v27 }
  0xee   : > { %v678_v29 = vmax.f32 %v676_v27, %v677_v28  ;;  %v1384_v27 = vld [vmem:[%s2300_s6 + $0x1] ss:$0 sm:$0xff] }
  0xf0   : > { %679 = vst [vmem:[#allocation2 + $0x1] sm:$0xff] %v678_v29 }
  0xf7   : > { %v680_v33 = vld [vmem:[#allocation2] ss:$2 sm:$0x1f]  ;;  %v682_v34 = vld [vmem:[#allocation2 + $0x1] ss:$2 sm:$0x1f] }
  0xf8   : > { %780 = vmatmul.mubr.f32.vlgmr.msra.gmra.mxu0 %v680_v33  ;;  %1502 = vmatmul.mubr.f32.vlgmr.msra.gmra.mxu1 %v682_v34 }
  0xf9   : > { %928 = vmatpush1.msra.mxu0 %v925_v30  ;;  %1505 = vmatpush3.msra.mxu1 %v1013_v31  ;;  %v1137_v30 = vld [vmem:[%s2304_s10 + $0xf0] sm:$0xff]  ;;  %v1225_v31 = vld [vmem:[%s2305_s11 + $0x78] sm:$0xff] }
  0xfa   : > { %929 = vmatprep.subr.mxu0 %v924_v32  ;;  %1506 = vmatprep.subr.mxu1 %v1595_v4  ;;  %v1136_v32 = vld [vmem:[%s2304_s10 + $0xe8] sm:$0xff] }
  0xfb   : > { %930 = vmatpush1.msra.mxu0 %v923_v35  ;;  %1507 = vmatpush3.msra.mxu1 %v1012_v36  ;;  %v1135_v35 = vld [vmem:[%s2304_s10 + $0xe0] sm:$0xff]  ;;  %v1224_v36 = vld [vmem:[%s2305_s11 + $0x70] sm:$0xff] }
  0xfc   : > { %931 = vmatprep.subr.mxu0 %v922_v37  ;;  %1508 = vmatprep.subr.mxu1 %v1595_v4  ;;  %v1134_v37 = vld [vmem:[%s2304_s10 + $0xd8] sm:$0xff] }
  0xfd   : > { %932 = vmatpush1.msra.mxu0 %v921_v38  ;;  %1509 = vmatpush3.msra.mxu1 %v1011_v39  ;;  %v1133_v38 = vld [vmem:[%s2304_s10 + $0xd0] sm:$0xff]  ;;  %v1223_v39 = vld [vmem:[%s2305_s11 + $0x68] sm:$0xff] }
  0xfe   : > { %933 = vmatprep.subr.mxu0 %v920_v40  ;;  %1510 = vmatprep.subr.mxu1 %v1595_v4  ;;  %v1132_v40 = vld [vmem:[%s2304_s10 + $0xc8] sm:$0xff] }
  0xff   : > { %991 = vmatprep.mubr.f32.mxu0 %v1595_v4  ;;  %1536 = vmatprep.mubr.msk.f32.mxu1 %vm1596_vm1, %v1595_v4 }
 0x100   : > { %934 = vmatpush1.msra.mxu0 %v919_v41  ;;  %1511 = vmatpush3.msra.mxu1 %v1010_v42  ;;  %v1131_v41 = vld [vmem:[%s2304_s10 + $0xc0] sm:$0xff] }
 0x101   : > { %935 = vmatprep.subr.mxu0 %v918_v43  ;;  %1512 = vmatprep.subr.mxu1 %v1595_v4  ;;  %v1222_v42 = vld [vmem:[%s2305_s11 + $0x60] sm:$0xff]  ;;  %v1130_v43 = vld [vmem:[%s2304_s10 + $0xb8] sm:$0xff] }
 0x102   : > { %936 = vmatpush1.msra.mxu0 %v917_v44  ;;  %1513 = vmatpush3.msra.mxu1 %v1009_v45  ;;  %v1129_v44 = vld [vmem:[%s2304_s10 + $0xb0] sm:$0xff]  ;;  %v1221_v45 = vld [vmem:[%s2305_s11 + $0x58] sm:$0xff] }
 0x103   : > { %937 = vmatprep.subr.mxu0 %v916_v46  ;;  %1514 = vmatprep.subr.mxu1 %v1595_v4  ;;  %v1128_v46 = vld [vmem:[%s2304_s10 + $0xa8] sm:$0xff] }
 0x104   : > { %938 = vmatpush1.msra.mxu0 %v915_v47  ;;  %1515 = vmatpush3.msra.mxu1 %v1008_v48  ;;  %v1127_v47 = vld [vmem:[%s2304_s10 + $0xa0] sm:$0xff]  ;;  %v1220_v48 = vld [vmem:[%s2305_s11 + $0x50] sm:$0xff] }
 0x105   : > { %939 = vmatprep.subr.mxu0 %v914_v49  ;;  %1516 = vmatprep.subr.mxu1 %v1595_v4  ;;  %v1126_v49 = vld [vmem:[%s2304_s10 + $0x98] sm:$0xff] }
 0x106   : > { %940 = vmatpush1.msra.mxu0 %v913_v50  ;;  %1517 = vmatpush3.msra.mxu1 %v1007_v51  ;;  %v1125_v50 = vld [vmem:[%s2304_s10 + $0x90] sm:$0xff]  ;;  %v1219_v51 = vld [vmem:[%s2305_s11 + $0x48] sm:$0xff] }
 0x107   : > { %941 = vmatprep.subr.mxu0 %v912_v52  ;;  %1518 = vmatprep.subr.mxu1 %v1595_v4  ;;  %v1124_v52 = vld [vmem:[%s2304_s10 + $0x88] sm:$0xff] }
 0x108   : > { %942 = vmatpush1.msra.mxu0 %v911_v53  ;;  %1519 = vmatpush3.msra.mxu1 %v1006_v54  ;;  %v1123_v53 = vld [vmem:[%s2304_s10 + $0x80] sm:$0xff] }
 0x109   : > { %943 = vmatprep.subr.mxu0 %v910_v55  ;;  %1520 = vmatprep.subr.mxu1 %v1595_v4  ;;  %v1218_v54 = vld [vmem:[%s2305_s11 + $0x40] sm:$0xff]  ;;  %v1122_v55 = vld [vmem:[%s2304_s10 + $0x78] sm:$0xff] }
 0x10a   : > { %944 = vmatpush1.msra.mxu0 %v909_v56  ;;  %1521 = vmatpush3.msra.mxu1 %v1005_v57  ;;  %v1121_v56 = vld [vmem:[%s2304_s10 + $0x70] sm:$0xff]  ;;  %v1217_v57 = vld [vmem:[%s2305_s11 + $0x38] sm:$0xff] }
 0x10b   : > { %945 = vmatprep.subr.mxu0 %v908_v58  ;;  %1522 = vmatprep.subr.mxu1 %v1595_v4  ;;  %v1120_v58 = vld [vmem:[%s2304_s10 + $0x68] sm:$0xff] }
 0x10c   : > { %946 = vmatpush1.msra.mxu0 %v907_v59  ;;  %1523 = vmatpush3.msra.mxu1 %v1004_v60  ;;  %v1119_v59 = vld [vmem:[%s2304_s10 + $0x60] sm:$0xff]  ;;  %v1216_v60 = vld [vmem:[%s2305_s11 + $0x30] sm:$0xff] }
 0x10d   : > { %947 = vmatprep.subr.mxu0 %v906_v61  ;;  %1524 = vmatprep.subr.mxu1 %v1595_v4  ;;  %v1118_v61 = vld [vmem:[%s2304_s10 + $0x58] sm:$0xff] }
 0x10e   : > { %948 = vmatpush1.msra.mxu0 %v905_v62  ;;  %1525 = vmatpush3.msra.mxu1 %v1003_v63  ;;  %v1117_v62 = vld [vmem:[%s2304_s10 + $0x50] sm:$0xff]  ;;  %v1215_v63 = vld [vmem:[%s2305_s11 + $0x28] sm:$0xff] }
 0x10f   : > { %949 = vmatprep.subr.mxu0 %v904_v0  ;;  %1526 = vmatprep.subr.mxu1 %v1595_v4  ;;  %v1116_v0 = vld [vmem:[%s2304_s10 + $0x48] sm:$0xff] }
 0x110   : > { %950 = vmatpush1.msra.mxu0 %v903_v1  ;;  %1527 = vmatpush3.msra.mxu1 %v1002_v2  ;;  %v1115_v1 = vld [vmem:[%s2304_s10 + $0x40] sm:$0xff] }
 0x111   : > { %951 = vmatprep.subr.mxu0 %v902_v3  ;;  %1528 = vmatprep.subr.mxu1 %v1595_v4  ;;  %v1214_v2 = vld [vmem:[%s2305_s11 + $0x20] sm:$0xff]  ;;  %v1114_v3 = vld [vmem:[%s2304_s10 + $0x38] sm:$0xff] }
 0x112   : > { %952 = vmatpush1.msra.mxu0 %v901_v5  ;;  %1529 = vmatpush3.msra.mxu1 %v1001_v6  ;;  %v1113_v5 = vld [vmem:[%s2304_s10 + $0x30] sm:$0xff]  ;;  %v1213_v6 = vld [vmem:[%s2305_s11 + $0x18] sm:$0xff] }
 0x113   : > { %953 = vmatprep.subr.mxu0 %v900_v7  ;;  %1530 = vmatprep.subr.mxu1 %v1595_v4  ;;  %v1112_v7 = vld [vmem:[%s2304_s10 + $0x28] sm:$0xff] }
 0x114   : > { %954 = vmatpush1.msra.mxu0 %v899_v8  ;;  %1531 = vmatpush3.msra.mxu1 %v1000_v9  ;;  %v1111_v8 = vld [vmem:[%s2304_s10 + $0x20] sm:$0xff]  ;;  %v1212_v9 = vld [vmem:[%s2305_s11 + $0x10] sm:$0xff] }
 0x115   : > { %955 = vmatprep.subr.mxu0 %v898_v10  ;;  %1532 = vmatprep.subr.mxu1 %v1595_v4  ;;  %v1110_v10 = vld [vmem:[%s2304_s10 + $0x18] sm:$0xff] }
 0x116   : > { %956 = vmatpush1.msra.mxu0 %v897_v11  ;;  %1533 = vmatpush3.msra.mxu1 %v999_v12  ;;  %v1109_v11 = vld [vmem:[%s2304_s10 + $0x10] sm:$0xff]  ;;  %v1211_v12 = vld [vmem:[%s2305_s11 + $0x8] sm:$0xff] }
 0x117   : > { %957 = vmatprep.subr.mxu0 %v896_v13  ;;  %1534 = vmatprep.subr.mxu1 %v1595_v4  ;;  %v1108_v13 = vld [vmem:[%s2304_s10 + $0x8] sm:$0xff] }
 0x118   : > { %958 = vmatpush1.msra.mxu0 %v895_v14  ;;  %1535 = vmatpush3.msra.mxu1 %v998_v15  ;;  %v1107_v14 = vld [vmem:[%s2304_s10] sm:$0xff] }
 0x119   : > { %1539 = vmatprep.subr.mxu1 %v1595_v4  ;;  %1139 = vmatprep.subr.mxu0 %v1138_v16  ;;  %v1210_v15 = vld [vmem:[%s2305_s11] sm:$0xff] }
 0x1b8   : > { %v781_v17 = vpop.f32.mrf.mxu0  ;;  %v868_v18 = vpop.f32.mrf.mxu1 }
 0x1ba   : > { %v783_v19 = vpop.f32.mrf.mxu0  ;;  %v1503_v20 = vpop.f32.mrf.mxu1 }
 0x1bb   : > { %v875_v21 = vrot.slane %v783_v19, 1 }
 0x1bd   : > { %v877_v22 = vadd.f32 %v875_v21, %v781_v17 }
 0x1bf   : > { %v878_v24 = vadd.f32 %v877_v22, %v868_v18  ;;  %v1385_v22 = vld [vmem:[%s2303_s9] ss:$0 sm:$0xff] }
 0x1c1   : > { %v883_v25 = vadd.f32 %v1383_v23, %v878_v24 }
 0x1c3   : > { %v884_v26 = vmul.f32 0.2, %v883_v25 }
 0x1c5   : > { %v885_v28 = vmax.f32 %v883_v25, %v884_v26  ;;  %v1386_v26 = vld [vmem:[%s2303_s9 + $0x1] ss:$0 sm:$0xff] }
 0x1c7   : > { %v890_v29 = vadd.f32 %v1384_v27, %v885_v28 }
 0x1c9   : > { %891 = vst [vmem:[#allocation3 + $0x1] sm:$0xf] %v890_v29 }
 0x1d0   : > { %v892_v33 = vld [vmem:[#allocation3] ss:$2 sm:$0x7]  ;;  %v894_v34 = vld [vmem:[#allocation3 + $0x1] ss:$2 sm:$0x7] }
 0x1d1   : > { %992 = vmatmul.mubr.f32.vlgmr.msra.gmra.mxu0 %v892_v33  ;;  %1537 = vmatmul.mubr.f32.vlgmr.msra.gmra.mxu1 %v894_v34 }
 0x1d2   : > { %1140 = vmatpush1.msra.mxu0 %v1137_v30  ;;  %1540 = vmatpush3.msra.mxu1 %v1225_v31 }
 0x1d3   : > { %1141 = vmatprep.subr.mxu0 %v1136_v32  ;;  %1541 = vmatprep.subr.mxu1 %v1595_v4 }
 0x1d4   : > { %1142 = vmatpush1.msra.mxu0 %v1135_v35  ;;  %1542 = vmatpush3.msra.mxu1 %v1224_v36  ;;  %v1296_v36 = vld [vmem:[%s2306_s12] sm:$0x1] }
 0x1d5   : > { %1143 = vmatprep.subr.mxu0 %v1134_v37  ;;  %1543 = vmatprep.subr.mxu1 %v1595_v4 }
 0x1d6   : > { %1144 = vmatpush1.msra.mxu0 %v1133_v38  ;;  %1544 = vmatpush3.msra.mxu1 %v1223_v39 }
 0x1d7   : > { %1145 = vmatprep.subr.mxu0 %v1132_v40  ;;  %1545 = vmatprep.subr.mxu1 %v1595_v4  ;;  %v1297_v40 = vld [vmem:[%s2306_s12 + $0x1] sm:$0x1] }
 0x1d8   : > { %1203 = vmatprep.mubr.f32.mxu0 %v1595_v4  ;;  %1571 = vmatprep.mubr.msk.f32.mxu1 %vm1596_vm1, %v1595_v4 }
 0x1d9   : > { %1146 = vmatpush1.msra.mxu0 %v1131_v41  ;;  %1546 = vmatpush3.msra.mxu1 %v1222_v42  ;;  %v1307_v42 = vld [vmem:[%s2307_s13] sm:$0x1] }
 0x1da   : > { %1147 = vmatprep.subr.mxu0 %v1130_v43  ;;  %1547 = vmatprep.subr.mxu1 %v1595_v4 }
 0x1db   : > { %1148 = vmatpush1.msra.mxu0 %v1129_v44  ;;  %1548 = vmatpush3.msra.mxu1 %v1221_v45 }
 0x1dc   : > { %1149 = vmatprep.subr.mxu0 %v1128_v46  ;;  %1549 = vmatprep.subr.mxu1 %v1595_v4 }
 0x1dd   : > { %1150 = vmatpush1.msra.mxu0 %v1127_v47  ;;  %1550 = vmatpush3.msra.mxu1 %v1220_v48 }
 0x1de   : > { %1151 = vmatprep.subr.mxu0 %v1126_v49  ;;  %1551 = vmatprep.subr.mxu1 %v1595_v4 }
 0x1df   : > { %1152 = vmatpush1.msra.mxu0 %v1125_v50  ;;  %1552 = vmatpush3.msra.mxu1 %v1219_v51 }
 0x1e0   : > { %1153 = vmatprep.subr.mxu0 %v1124_v52  ;;  %1553 = vmatprep.subr.mxu1 %v1595_v4 }
 0x1e1   : > { %1154 = vmatpush1.msra.mxu0 %v1123_v53  ;;  %1554 = vmatpush3.msra.mxu1 %v1218_v54 }
 0x1e2   : > { %1155 = vmatprep.subr.mxu0 %v1122_v55  ;;  %1555 = vmatprep.subr.mxu1 %v1595_v4 }
 0x1e3   : > { %1156 = vmatpush1.msra.mxu0 %v1121_v56  ;;  %1556 = vmatpush3.msra.mxu1 %v1217_v57 }
 0x1e4   : > { %1157 = vmatprep.subr.mxu0 %v1120_v58  ;;  %1557 = vmatprep.subr.mxu1 %v1595_v4 }
 0x1e5   : > { %1158 = vmatpush1.msra.mxu0 %v1119_v59  ;;  %1558 = vmatpush3.msra.mxu1 %v1216_v60 }
 0x1e6   : > { %1159 = vmatprep.subr.mxu0 %v1118_v61  ;;  %1559 = vmatprep.subr.mxu1 %v1595_v4 }
 0x1e7   : > { %1160 = vmatpush1.msra.mxu0 %v1117_v62  ;;  %1560 = vmatpush3.msra.mxu1 %v1215_v63 }
 0x1e8   : > { %1161 = vmatprep.subr.mxu0 %v1116_v0  ;;  %1561 = vmatprep.subr.mxu1 %v1595_v4 }
 0x1e9   : > { %1162 = vmatpush1.msra.mxu0 %v1115_v1  ;;  %1562 = vmatpush3.msra.mxu1 %v1214_v2 }
 0x1ea   : > { %1163 = vmatprep.subr.mxu0 %v1114_v3  ;;  %1563 = vmatprep.subr.mxu1 %v1595_v4 }
 0x1eb   : > { %1164 = vmatpush1.msra.mxu0 %v1113_v5  ;;  %1564 = vmatpush3.msra.mxu1 %v1213_v6 }
 0x1ec   : > { %1165 = vmatprep.subr.mxu0 %v1112_v7  ;;  %1565 = vmatprep.subr.mxu1 %v1595_v4 }
 0x1ed   : > { %1166 = vmatpush1.msra.mxu0 %v1111_v8  ;;  %1566 = vmatpush3.msra.mxu1 %v1212_v9 }
 0x1ee   : > { %1167 = vmatprep.subr.mxu0 %v1110_v10  ;;  %1567 = vmatprep.subr.mxu1 %v1595_v4 }
 0x1ef   : > { %1168 = vmatpush1.msra.mxu0 %v1109_v11  ;;  %1568 = vmatpush3.msra.mxu1 %v1211_v12 }
 0x1f0   : > { %1169 = vmatprep.subr.mxu0 %v1108_v13  ;;  %1569 = vmatprep.subr.mxu1 %v1595_v4 }
 0x1f1   : > { %1170 = vmatpush1.msra.mxu0 %v1107_v14  ;;  %1570 = vmatpush3.msra.mxu1 %v1210_v15 }
 0x291   : > { %v993_v16 = vpop.f32.mrf.mxu0  ;;  %v1080_v17 = vpop.f32.mrf.mxu1 }
 0x293   : > { %v995_v18 = vpop.f32.mrf.mxu0  ;;  %v1538_v19 = vpop.f32.mrf.mxu1 }
 0x294   : > { %v1087_v20 = vrot.slane %v995_v18, 1 }
 0x296   : > { %v1089_v21 = vadd.f32 %v1087_v20, %v993_v16 }
 0x298   : > { %v1090_v23 = vadd.f32 %v1089_v21, %v1080_v17 }
 0x29a   : > { %v1095_v24 = vadd.f32 %v1385_v22, %v1090_v23 }
 0x29c   : > { %v1096_v25 = vmul.f32 0.2, %v1095_v24 }
 0x29e   : > { %v1097_v4 = vmax.f32 %v1095_v24, %v1096_v25 }
 0x2a0   : > { %v1102_v27 = vadd.f32 %v1386_v26, %v1097_v4 }
 0x2a2   : > { %1103 = vst [vmem:[#allocation4 + $0x1] sm:$0x3] %v1102_v27 }
 0x2a9   : > { %v1104_v28 = vld [vmem:[#allocation4] ss:$2 sm:$0x3]  ;;  %v1106_v29 = vld [vmem:[#allocation4 + $0x1] ss:$2 sm:$0x3] }
 0x2aa   : > { %1204 = vmatmul.mubr.f32.vlgmr.msra.gmra.mxu0 %v1104_v28  ;;  %1572 = vmatmul.mubr.f32.vlgmr.msra.gmra.mxu1 %v1106_v29 }
 0x36a   : > { %v1205_v30 = vpop.f32.mrf.mxu0  ;;  %v1292_v31 = vpop.f32.mrf.mxu1 }
 0x36c   : > { %v1207_v32 = vpop.f32.mrf.mxu0  ;;  %v1573_v33 = vpop.f32.mrf.mxu1 }
 0x36d   : > { %v1299_v34 = vrot.slane %v1207_v32, 1 }
 0x36f   : > { %v1301_v35 = vadd.f32 %v1299_v34, %v1205_v30 }
 0x371   : > { %v1302_v37 = vadd.f32 %v1301_v35, %v1292_v31 }
 0x373   : > { %v1303_v38 = vadd.f32 %v1302_v37, %v1296_v36 }
 0x375   : > { %v1304_v39 = vmul.f32 0.2, %v1303_v38 }
 0x377   : > { %v1305_v41 = vmax.f32 %v1303_v38, %v1304_v39 }
 0x379   : > { %v1306_v43 = vadd.f32 %v1305_v41, %v1297_v40 }
 0x37b   : > { %v1308_v44 = vmul.f32 %v1307_v42, %v1306_v43 }
 0x37d   : > { %v1310_v45 = vsel %vm1309_vm3, %v1308_v44, 0.0 }
 0x37e   : > { %1311 = vadd.xlane.f32.xlu0 %v1310_v45 }
 0x407   : > { %v1312_v46 = vpop.xlane.xlu0 %1311 }
 0x408   : > { %v1313_v47 = vrot.slane %v1312_v46, 4 }
 0x40a   : > { %v1314_v48 = vadd.f32 %v1313_v47, %v1312_v46 }
 0x40c   : > { %v1315_v49 = vrot.slane %v1314_v48, 2 }
 0x40e   : > { %v1316_v50 = vadd.f32 %v1315_v49, %v1314_v48 }
 0x410   : > { %v1317_v51 = vrot.slane %v1316_v50, 1 }
 0x412   : > { %v1318_v52 = vadd.f32 %v1317_v51, %v1316_v50 }
 0x414   : > { %1575 = vpush %v1318_v52 }
 0x445   : > { %s1576_s25 = spop %1575 }
 0x446   : > { %v1320_v53 = vstv %s1576_s25 }
 0x447   : > { %1321 = vst [vmem:[%s463_s16] sm:$0x1] %v1320_v53 }
 0x448 PF: > { %s24_s29 = sadd.s32 1, %s1593_s29  }
 0x449   : > { %p21_p4 = scmp.ge.s32.totalorder %s24_s29, 4  }
 0x44b   :  { %23 = sbr.rel (!%p21_p4) target bundleno = 1 (0x1), region = 112 }

</bundles_post_ra>
